<compile_context>
chip_gen: v5e
topology: v5e:2x2
jax: 0.10.0
libtpu: 0.0.40
codegen_flags: <defaults>
</compile_context>

<pallas_src>
import functools

import jax
import jax.numpy as jnp
from jax import lax
from jax.experimental import pallas as pl
from jax.experimental.pallas import tpu as pltpu

_LANES = 128


def _pack_params(arrs):
    """Concatenate small parameter tensors into one (R, 1) f32 column (1 DMA).

    Each segment is padded to an 8-row boundary so every in-kernel slice
    starts on a vreg-aligned sublane offset.  Returns (packed, offsets).
    """
    segs, offsets, off = [], [], 0
    for a in arrs:
        flat = a.reshape(-1).astype(jnp.float32)
        offsets.append(off)
        pad = (-flat.shape[0]) % 8
        segs.append(jnp.pad(flat, (0, pad)))
        off += flat.shape[0] + pad
    return jnp.concatenate(segs).reshape(-1, 1), tuple(offsets)


def _prep_kernel(H, n_pad, halo, F, C, offs,
                 task_ref, pvec_ref, xh_ref, wtap_ref, k_ref, v_ref):
    """Grid-invariant work, done exactly once per forward call.

    Produces K (F, n_pad) and V (C, n_pad) in bf16 so the query-tile kernel
    never recomputes them.  The 3x3 conv taps read statically shifted windows
    of the zero-haloed flat X; the zero halo + zero-padded key columns make
    every flat out-of-range tap 0, so only row wraps along h need a mask.
    """
    o_wkx, o_bk, o_bconv = offs
    wk_task = task_ref[2]
    bk_task = task_ref[3]
    wv_task = task_ref[4]
    bv_task = task_ref[5]

    p = pvec_ref[...]
    wkx = p[o_wkx:o_wkx + F]          # (F, 1)
    bk = p[o_bk:o_bk + F]             # (F, 1)
    bconv = p[o_bconv:o_bconv + C]    # (C, 1)

    # K = WK_task * relu(WK_x * X + BK) + BK_task over every key position.
    x = xh_ref[:, halo:halo + n_pad]                                  # (F, n_pad)
    k = wk_task * jnp.maximum(wkx * x + bk, 0.0) + bk_task
    k_ref[...] = k.astype(k_ref.dtype)

    # 3x3 / pad=1 conv: tap (ky, kx) of output column n = w*H + h reads the
    # haloed flat X at n + (ky-1)*H + (kx-1).
    col = lax.broadcasted_iota(jnp.int32, (1, n_pad), 1) % H          # h index
    acc = jnp.zeros((C, n_pad), jnp.float32)
    for ky in range(3):
        for kx in range(3):
            d = (ky - 1) * H + (kx - 1)
            tap = xh_ref[:, halo + d:halo + d + n_pad]                # (F, n_pad)
            if kx == 0:                       # reads h-1: invalid at h == 0
                tap = jnp.where(col >= 1, tap, 0.0)
            elif kx == 2:                     # reads h+1: invalid at h == H-1
                tap = jnp.where(col <= H - 2, tap, 0.0)
            w_tap = wtap_ref[(ky * 3 + kx) * C:(ky * 3 + kx + 1) * C, :]  # (C, F)
            acc = acc + jnp.dot(w_tap, tap.astype(jnp.bfloat16),
                                preferred_element_type=jnp.float32)
    v = wv_task * (acc + bconv) + bv_task     # V = WV_task*(conv + b) + BV_task
    v_ref[...] = v.astype(v_ref.dtype)


def _attn_kernel(M, F, C, TQ, n_valid, n_pad, offs,
                 task_ref, pvec_ref, x_ref, prevq_ref, k_ref, v_ref,
                 out_ref, qout_ref):
    o_wqt, o_bq, o_wqx = offs
    MF = M * F
    wq_task = task_ref[0]
    bq_task = task_ref[1]

    p = pvec_ref[...]
    wqt = p[o_wqt:o_wqt + MF]         # (MF, 1)
    bq = p[o_bq:o_bq + MF]            # (MF, 1)
    wqx = p[o_wqx:o_wqx + F]          # (F, 1)

    x_q = x_ref[...]                  # (F, TQ)   X at this query tile
    prev_q = prevq_ref[...]           # (MF, TQ)

    # Q for all heads in one full-vreg shot: the shared WQ_x * X term is tiled
    # across heads; each per-(head,feature) column broadcasts once over lanes.
    wx = wqx * x_q                                                    # (F, TQ)
    wx_all = jnp.concatenate([wx] * M, axis=0)                        # (MF, TQ)
    q = wq_task * jnp.maximum(wqt * prev_q + wx_all + bq, 0.0) + bq_task
    qout_ref[...] = q                                                 # new prev_Q

    q_sum = q[0:F]
    for m in range(1, M):
        q_sum = q_sum + q[m * F:(m + 1) * F]                          # (F, TQ)

    # Similarity, produced pre-transposed (keys on sublanes): bf16 MXU
    # operands, f32 accumulation; max subtraction keeps the softmax stable.
    simT = lax.dot_general(k_ref[...], q_sum.astype(jnp.bfloat16),
                           (((0,), (0,)), ((), ())),
                           preferred_element_type=jnp.float32)        # (n_pad, TQ)

    # Deferred softmax over the key (sublane) axis.
    mx = jnp.max(simT, axis=0, keepdims=True)                         # (1, TQ)
    e = jnp.exp(simT - mx)                                            # (n_pad, TQ)
    if n_valid != n_pad:
        # Padded key columns must not pollute the softmax denominator.
        key_idx = lax.broadcasted_iota(jnp.int32, (n_pad, 1), 0)
        e = jnp.where(key_idx < n_valid, e, 0.0)
    l = jnp.sum(e, axis=0, keepdims=True)                             # (1, TQ)

    # out[c, q] = (sum_key V[c, key] * e[key, q]) / l[q]; bf16 MXU operands,
    # f32 accumulate, normalization via EUP reciprocal.
    num = lax.dot_general(v_ref[...], e.astype(jnp.bfloat16),
                          (((1,), (0,)), ((), ())),
                          preferred_element_type=jnp.float32)         # (C, TQ)
    out_ref[...] = num * pl.reciprocal(l, approx=True)


@jax.jit
def multi_head_attn_forward(X, prev_Q, params, task):
    F, W, H = X.shape
    M = prev_Q.shape[0]
    C = params["conv_w"].shape[0]
    MF = M * F
    N = W * H
    TQ = _LANES
    n_pad = ((N + TQ - 1) // TQ) * TQ        # lane-dense stores, >=1 query tiles
    halo = H + 1                             # covers the largest conv tap shift

    x_flat = jnp.pad(X.reshape(F, N).astype(jnp.float32),
                     ((0, 0), (0, n_pad - N)))
    x_halo = jnp.pad(x_flat, ((0, 0), (halo, halo)))
    prevq_flat = jnp.pad(prev_Q.reshape(MF, N).astype(jnp.float32),
                         ((0, 0), (0, n_pad - N)))

    # Conv taps reordered to (ky, kx, c, f): the prep kernel takes a (C, F)
    # row block per tap; no im2col array is ever materialized.
    wtap = params["conv_w"].transpose(2, 3, 0, 1).reshape(9 * C, F).astype(jnp.bfloat16)

    pvec_prep, offs_prep = _pack_params(
        [params["WK_x"], params["BK"], params["conv_b"]])
    pvec_attn, offs_attn = _pack_params(
        [params["WQ_t_minus_1"], params["BQ"], params["WQ_x"]])

    task_arr = jnp.stack([task["WQ_task"], task["BQ_task"], task["WK_task"],
                          task["BK_task"], task["WV_task"], task["BV_task"]]
                         ).astype(jnp.float32)

    # --- Kernel 1: grid-invariant K / V, computed exactly once. ---
    k_all, v_all = pl.pallas_call(
        functools.partial(_prep_kernel, H, n_pad, halo, F, C, offs_prep),
        grid=(1,),
        in_specs=[
            pl.BlockSpec(memory_space=pltpu.MemorySpace.SMEM),        # task scalars
            pl.BlockSpec((pvec_prep.shape[0], 1), lambda i: (0, 0)),  # packed params
            pl.BlockSpec((F, n_pad + 2 * halo), lambda i: (0, 0)),    # zero-haloed X
            pl.BlockSpec((9 * C, F), lambda i: (0, 0)),               # conv taps
        ],
        out_specs=(
            pl.BlockSpec((F, n_pad), lambda i: (0, 0)),               # K
            pl.BlockSpec((C, n_pad), lambda i: (0, 0)),               # V
        ),
        out_shape=(jax.ShapeDtypeStruct((F, n_pad), jnp.bfloat16),
                   jax.ShapeDtypeStruct((C, n_pad), jnp.bfloat16)),
        compiler_params=pltpu.CompilerParams(
            dimension_semantics=("arbitrary",)),
    )(task_arr, pvec_prep, x_halo, wtap)

    # --- Kernel 2: per-query-tile attention. ---
    # VMEM budget: double-buffered streaming tiles + resident K/V/params +
    # simT/e intermediates; clamp below v7x's 64 MiB per-TC physical budget.
    est = (2 * (F + 2 * MF + C) * TQ * 4
           + 2 * ((F + C) * n_pad * 2 + pvec_attn.shape[0] * 4)
           + (2 * n_pad * TQ + 4 * MF * TQ) * 4)
    vmem_limit = int(min(48 * 2 ** 20, max(8 * 2 ** 20, 2 * est)))

    out_flat, qnew_flat = pl.pallas_call(
        functools.partial(_attn_kernel, M, F, C, TQ, N, n_pad, offs_attn),
        grid=(n_pad // TQ,),
        in_specs=[
            pl.BlockSpec(memory_space=pltpu.MemorySpace.SMEM),        # task scalars
            pl.BlockSpec((pvec_attn.shape[0], 1), lambda i: (0, 0)),  # packed params
            pl.BlockSpec((F, TQ), lambda i: (0, i)),                  # X query tile
            pl.BlockSpec((MF, TQ), lambda i: (0, i)),                 # prev_Q tile
            pl.BlockSpec((F, n_pad), lambda i: (0, 0)),               # K (all keys)
            pl.BlockSpec((C, n_pad), lambda i: (0, 0)),               # V (all keys)
        ],
        out_specs=(
            pl.BlockSpec((C, TQ), lambda i: (0, i)),                  # out tile
            pl.BlockSpec((MF, TQ), lambda i: (0, i)),                 # new prev_Q tile
        ),
        out_shape=(jax.ShapeDtypeStruct((C, n_pad), jnp.float32),
                   jax.ShapeDtypeStruct((MF, n_pad), jnp.float32)),
        input_output_aliases={3: 1},    # donate the padded prev_Q staging buffer
        compiler_params=pltpu.CompilerParams(
            dimension_semantics=("parallel",),
            vmem_limit_bytes=vmem_limit),
    )(task_arr, pvec_attn, x_flat, prevq_flat, k_all, v_all)

    out = out_flat[:, :N].reshape(C, W, H)
    q_new = qnew_flat[:, :N].reshape(M, F, W, H)
    return out, q_new


def reference(X, prev_Q, params, task):
    """Pure-JAX mirror of the PyTorch forward, for verification."""
    relu = lambda a: jnp.maximum(a, 0.0)
    reshaped_X = X[None]                                    # (1, F, W, H)
    Q = (task["WQ_task"]
         * relu(params["WQ_t_minus_1"] * prev_Q
                + params["WQ_x"] * reshaped_X + params["BQ"])
         + task["BQ_task"])                                 # (M, F, W, H)
    K = (task["WK_task"] * relu(params["WK_x"] * X + params["BK"])
         + task["BK_task"])                                 # (F, W, H)
    M, F, W, H = Q.shape
    sim = jnp.einsum("mfwh,fuv->whuv", Q, K)                # (W, H, W, H)
    attn = jax.nn.softmax(sim.reshape(W, H, -1), axis=2)    # (W, H, WH)
    conv = lax.conv_general_dilated(
        reshaped_X, params["conv_w"], window_strides=(1, 1), padding="SAME",
        dimension_numbers=("NCHW", "OIHW", "NCHW"))
    conv = conv + params["conv_b"][None, :, None, None]
    V = task["WV_task"] * conv + task["BV_task"]            # (1, C, W, H)
    V = V.reshape(V.shape[1], -1)                           # (C, WH)
    out = jnp.einsum("whk,ck->whc", attn, V)
    return jnp.transpose(out, (2, 0, 1)), Q                 # (C, W, H), new prev_Q


if __name__ == "__main__":
    n_heads, n_features, C_down = 2, 4, 3

    # Second case has W*H not a multiple of 128 to exercise the padded-key path.
    for (W, H) in ((16, 16), (16, 12)):
        key = jax.random.PRNGKey(0)
        ks = jax.random.split(key, 9)
        X = jax.random.normal(ks[0], (n_features, W, H), jnp.float32)
        prev_Q = jax.random.normal(ks[1], (n_heads, n_features, W, H), jnp.float32)

        params = {
            "WQ_t_minus_1": jax.random.uniform(ks[2], (n_heads, n_features, 1, 1), jnp.float32),
            "WQ_x":         jax.random.uniform(ks[3], (1, n_features, 1, 1), jnp.float32),
            "BQ":           jax.random.uniform(ks[4], (n_heads, n_features, 1, 1), jnp.float32),
            "WK_x":         jax.random.uniform(ks[5], (n_features, 1, 1), jnp.float32),
            "BK":           jax.random.uniform(ks[6], (n_features, 1, 1), jnp.float32),
            "conv_w":       jax.random.normal(ks[7], (C_down, n_features, 3, 3), jnp.float32) * 0.1,
            "conv_b":       jax.random.normal(ks[8], (C_down,), jnp.float32) * 0.1,
        }
        task = {"WQ_task": 0.9, "BQ_task": 0.1, "WK_task": 1.1,
                "BK_task": -0.05, "WV_task": 0.8, "BV_task": 0.2}

        out, q_new = multi_head_attn_forward(X, prev_Q, params, task)
        out = jax.block_until_ready(out)
        q_new = jax.block_until_ready(q_new)

        ref_out, ref_q = reference(X, prev_Q, params, task)
        # q_new is pure f32 elementwise -> tight tolerance.
        assert jnp.allclose(q_new, ref_q, atol=1e-4, rtol=1e-4), \
            (W, H, float(jnp.max(jnp.abs(q_new - ref_q))))
        # out uses bf16 MXU operands (conv, similarity, attn@V) + approx
        # reciprocal -> slightly relaxed tolerance.
        assert jnp.allclose(out, ref_out, atol=3e-2, rtol=3e-2), \
            (W, H, float(jnp.max(jnp.abs(out - ref_out))))

    print("KERNEL_OK")
</pallas_src>

<mosaic_0001>
module attributes {stable_mosaic.version = 11 : i64} {
  func.func @_attn_kernel(%arg0: i32, %arg1: memref<6xf32, #tpu.memory_space<smem>>, %arg2: memref<24x1xf32, #tpu.memory_space<vmem>>, %arg3: memref<4x128xf32, #tpu.memory_space<vmem>>, %arg4: memref<8x128xf32, #tpu.memory_space<vmem>>, %arg5: memref<4x256xbf16, #tpu.memory_space<vmem>>, %arg6: memref<3x256xbf16, #tpu.memory_space<vmem>>, %arg7: memref<3x128xf32, #tpu.memory_space<vmem>>, %arg8: memref<8x128xf32, #tpu.memory_space<vmem>>) attributes {dimension_semantics = [#tpu.dimension_semantics<parallel>], iteration_bounds = array<i64: 2>, scalar_prefetch = 0 : i64, scratch_operands = 0 : i64, tpu.core_type = #tpu.core_type<tc>, window_params = [{transform_indices = @transform_0, window_bounds = array<i64: 6>}, {pipeline_mode = #tpu.pipeline_mode<synchronous>, transform_indices = @transform_1, window_bounds = array<i64: 24, 1>}, {transform_indices = @transform_2, window_bounds = array<i64: 4, 128>}, {transform_indices = @transform_3, window_bounds = array<i64: 8, 128>}, {pipeline_mode = #tpu.pipeline_mode<synchronous>, transform_indices = @transform_4, window_bounds = array<i64: 4, 256>}, {pipeline_mode = #tpu.pipeline_mode<synchronous>, transform_indices = @transform_5, window_bounds = array<i64: 3, 256>}, {transform_indices = @transform_6, window_bounds = array<i64: 3, 128>}, {transform_indices = @transform_7, window_bounds = array<i64: 8, 128>}]} {
    %c0 = arith.constant 0 : index
    %0 = memref.load %arg1[%c0] : memref<6xf32, #tpu.memory_space<smem>>
    %c1 = arith.constant 1 : index
    %1 = memref.load %arg1[%c1] : memref<6xf32, #tpu.memory_space<smem>>
    %c0_0 = arith.constant 0 : index
    %c0_1 = arith.constant 0 : index
    %2 = vector.load %arg2[%c0_0, %c0_1] : memref<24x1xf32, #tpu.memory_space<vmem>>, vector<24x1xf32>
    %3 = vector.extract_strided_slice %2 {offsets = [0, 0], sizes = [8, 1], strides = [1, 1]} : vector<24x1xf32> to vector<8x1xf32>
    %4 = vector.extract_strided_slice %2 {offsets = [8, 0], sizes = [8, 1], strides = [1, 1]} : vector<24x1xf32> to vector<8x1xf32>
    %5 = vector.extract_strided_slice %2 {offsets = [16, 0], sizes = [4, 1], strides = [1, 1]} : vector<24x1xf32> to vector<4x1xf32>
    %c0_2 = arith.constant 0 : index
    %c0_3 = arith.constant 0 : index
    %6 = vector.load %arg3[%c0_2, %c0_3] : memref<4x128xf32, #tpu.memory_space<vmem>>, vector<4x128xf32>
    %c0_4 = arith.constant 0 : index
    %c0_5 = arith.constant 0 : index
    %7 = vector.load %arg4[%c0_4, %c0_5] : memref<8x128xf32, #tpu.memory_space<vmem>>, vector<8x128xf32>
    %8 = vector.broadcast %5 : vector<4x1xf32> to vector<4x128xf32>
    %9 = arith.mulf %8, %6 : vector<4x128xf32>
    %10 = tpu.concatenate %9, %9 in 0 : vector<4x128xf32>, vector<4x128xf32> -> vector<8x128xf32>
    %11 = vector.broadcast %3 : vector<8x1xf32> to vector<8x128xf32>
    %12 = arith.mulf %11, %7 : vector<8x128xf32>
    %13 = arith.addf %12, %10 : vector<8x128xf32>
    %14 = vector.broadcast %4 : vector<8x1xf32> to vector<8x128xf32>
    %15 = arith.addf %13, %14 : vector<8x128xf32>
    %cst = arith.constant 0.000000e+00 : f32
    %16 = vector.broadcast %cst : f32 to vector<8x128xf32>
    %17 = arith.maximumf %15, %16 : vector<8x128xf32>
    %18 = vector.broadcast %0 : f32 to vector<8x128xf32>
    %19 = arith.mulf %18, %17 : vector<8x128xf32>
    %20 = vector.broadcast %1 : f32 to vector<8x128xf32>
    %21 = arith.addf %19, %20 : vector<8x128xf32>
    %c0_6 = arith.constant 0 : index
    %c0_7 = arith.constant 0 : index
    %22 = vector.load %arg8[%c0_6, %c0_7] : memref<8x128xf32, #tpu.memory_space<vmem>>, vector<8x128xf32>
    tpu.vector_store %arg8[%c0_6, %c0_7], %21 {strides = array<i32>} : memref<8x128xf32, #tpu.memory_space<vmem>>, vector<8x128xf32>,
    %23 = vector.extract_strided_slice %21 {offsets = [0, 0], sizes = [4, 128], strides = [1, 1]} : vector<8x128xf32> to vector<4x128xf32>
    %24 = vector.extract_strided_slice %21 {offsets = [4, 0], sizes = [4, 128], strides = [1, 1]} : vector<8x128xf32> to vector<4x128xf32>
    %25 = arith.addf %23, %24 : vector<4x128xf32>
    %c0_8 = arith.constant 0 : index
    %c0_9 = arith.constant 0 : index
    %26 = vector.load %arg5[%c0_8, %c0_9] : memref<4x256xbf16, #tpu.memory_space<vmem>>, vector<4x256xbf16>
    %27 = arith.truncf %25 : vector<4x128xf32> to vector<4x128xbf16>
    %cst_10 = arith.constant dense<0.000000e+00> : vector<256x128xf32>
    %28 = tpu.matmul %26, %27, %cst_10 {dimension_numbers = #tpu.dot_dimension_numbers<[0], [0], [1], [1], [0, 1, 1, 1], [], []>} : vector<4x256xbf16>, vector<4x128xbf16>, vector<256x128xf32> -> vector<256x128xf32>
    %cst_11 = arith.constant dense<0xFF800000> : vector<128xf32>
    %29 = vector.multi_reduction <maximumf>, %28, %cst_11 [0] : vector<256x128xf32> to vector<128xf32>
    %30 = vector.shape_cast %29 : vector<128xf32> to vector<1x128xf32>
    %31 = vector.broadcast %30 : vector<1x128xf32> to vector<256x128xf32>
    %32 = arith.subf %28, %31 : vector<256x128xf32>
    %33 = math.exp %32 : vector<256x128xf32>
    %cst_12 = arith.constant dense<0.000000e+00> : vector<128xf32>
    %34 = vector.multi_reduction <add>, %33, %cst_12 [0] : vector<256x128xf32> to vector<128xf32>
    %35 = vector.shape_cast %34 : vector<128xf32> to vector<1x128xf32>
    %c0_13 = arith.constant 0 : index
    %c0_14 = arith.constant 0 : index
    %36 = vector.load %arg6[%c0_13, %c0_14] : memref<3x256xbf16, #tpu.memory_space<vmem>>, vector<3x256xbf16>
    %37 = arith.truncf %33 : vector<256x128xf32> to vector<256x128xbf16>
    %cst_15 = arith.constant dense<0.000000e+00> : vector<3x128xf32>
    %38 = tpu.matmul %36, %37, %cst_15 {dimension_numbers = #tpu.dot_dimension_numbers<[1], [0], [0], [1], [0, 0, 1, 1], [], []>} : vector<3x256xbf16>, vector<256x128xbf16>, vector<3x128xf32> -> vector<3x128xf32>
    %39 = tpu.reciprocal %35 {approx = true} : vector<1x128xf32> -> vector<1x128xf32>
    %40 = vector.broadcast %39 : vector<1x128xf32> to vector<3x128xf32>
    %41 = arith.mulf %38, %40 : vector<3x128xf32>
    %c0_16 = arith.constant 0 : index
    %c0_17 = arith.constant 0 : index
    %42 = vector.load %arg7[%c0_16, %c0_17] : memref<3x128xf32, #tpu.memory_space<vmem>>, vector<3x128xf32>
    tpu.vector_store %arg7[%c0_16, %c0_17], %41 {strides = array<i32>} : memref<3x128xf32, #tpu.memory_space<vmem>>, vector<3x128xf32>,
    return
  }
  func.func @transform_0(%arg0: i32) -> i32 {
    %c0_i32 = arith.constant 0 : i32
    %c0_i32_0 = arith.constant 0 : i32
    return %c0_i32 : i32
  }
  func.func @transform_1(%arg0: i32) -> (i32, i32) {
    %c0_i32 = arith.constant 0 : i32
    %c0_i32_0 = arith.constant 0 : i32
    %c0_i32_1 = arith.constant 0 : i32
    return %c0_i32, %c0_i32_0 : i32, i32
  }
  func.func @transform_2(%arg0: i32) -> (i32, i32) {
    %c0_i32 = arith.constant 0 : i32
    %c0_i32_0 = arith.constant 0 : i32
    return %c0_i32, %arg0 : i32, i32
  }
  func.func @transform_3(%arg0: i32) -> (i32, i32) {
    %c0_i32 = arith.constant 0 : i32
    %c0_i32_0 = arith.constant 0 : i32
    return %c0_i32, %arg0 : i32, i32
  }
  func.func @transform_4(%arg0: i32) -> (i32, i32) {
    %c0_i32 = arith.constant 0 : i32
    %c0_i32_0 = arith.constant 0 : i32
    %c0_i32_1 = arith.constant 0 : i32
    return %c0_i32, %c0_i32_0 : i32, i32
  }
  func.func @transform_5(%arg0: i32) -> (i32, i32) {
    %c0_i32 = arith.constant 0 : i32
    %c0_i32_0 = arith.constant 0 : i32
    %c0_i32_1 = arith.constant 0 : i32
    return %c0_i32, %c0_i32_0 : i32, i32
  }
  func.func @transform_6(%arg0: i32) -> (i32, i32) {
    %c0_i32 = arith.constant 0 : i32
    %c0_i32_0 = arith.constant 0 : i32
    return %c0_i32, %arg0 : i32, i32
  }
  func.func @transform_7(%arg0: i32) -> (i32, i32) {
    %c0_i32 = arith.constant 0 : i32
    %c0_i32_0 = arith.constant 0 : i32
    return %c0_i32, %arg0 : i32, i32
  }
}

module attributes {stable_mosaic.version = 11 : i64} {
  func.func @_prep_kernel(%arg0: i32, %arg1: memref<6xf32, #tpu.memory_space<smem>>, %arg2: memref<24x1xf32, #tpu.memory_space<vmem>>, %arg3: memref<4x290xf32, #tpu.memory_space<vmem>>, %arg4: memref<27x4xbf16, #tpu.memory_space<vmem>>, %arg5: memref<4x256xbf16, #tpu.memory_space<vmem>>, %arg6: memref<3x256xbf16, #tpu.memory_space<vmem>>) attributes {dimension_semantics = [#tpu.dimension_semantics<arbitrary>], iteration_bounds = array<i64: 1>, scalar_prefetch = 0 : i64, scratch_operands = 0 : i64, tpu.core_type = #tpu.core_type<tc>, window_params = [{transform_indices = @transform_0, window_bounds = array<i64: 6>}, {pipeline_mode = #tpu.pipeline_mode<synchronous>, transform_indices = @transform_1, window_bounds = array<i64: 24, 1>}, {pipeline_mode = #tpu.pipeline_mode<synchronous>, transform_indices = @transform_2, window_bounds = array<i64: 4, 290>}, {pipeline_mode = #tpu.pipeline_mode<synchronous>, transform_indices = @transform_3, window_bounds = array<i64: 27, 4>}, {pipeline_mode = #tpu.pipeline_mode<synchronous>, transform_indices = @transform_4, window_bounds = array<i64: 4, 256>}, {pipeline_mode = #tpu.pipeline_mode<synchronous>, transform_indices = @transform_5, window_bounds = array<i64: 3, 256>}]} {
    %c2 = arith.constant 2 : index
    %0 = memref.load %arg1[%c2] : memref<6xf32, #tpu.memory_space<smem>>
    %c3 = arith.constant 3 : index
    %1 = memref.load %arg1[%c3] : memref<6xf32, #tpu.memory_space<smem>>
    %c4 = arith.constant 4 : index
    %2 = memref.load %arg1[%c4] : memref<6xf32, #tpu.memory_space<smem>>
    %c5 = arith.constant 5 : index
    %3 = memref.load %arg1[%c5] : memref<6xf32, #tpu.memory_space<smem>>
    %c0 = arith.constant 0 : index
    %c0_0 = arith.constant 0 : index
    %4 = vector.load %arg2[%c0, %c0_0] : memref<24x1xf32, #tpu.memory_space<vmem>>, vector<24x1xf32>
    %5 = vector.extract_strided_slice %4 {offsets = [0, 0], sizes = [4, 1], strides = [1, 1]} : vector<24x1xf32> to vector<4x1xf32>
    %6 = vector.extract_strided_slice %4 {offsets = [8, 0], sizes = [4, 1], strides = [1, 1]} : vector<24x1xf32> to vector<4x1xf32>
    %7 = vector.extract_strided_slice %4 {offsets = [16, 0], sizes = [3, 1], strides = [1, 1]} : vector<24x1xf32> to vector<3x1xf32>
    %c0_1 = arith.constant 0 : index
    %c17 = arith.constant 17 : index
    %8 = vector.load %arg3[%c0_1, %c17] : memref<4x290xf32, #tpu.memory_space<vmem>>, vector<4x256xf32>
    %9 = vector.broadcast %5 : vector<4x1xf32> to vector<4x256xf32>
    %10 = arith.mulf %9, %8 : vector<4x256xf32>
    %11 = vector.broadcast %6 : vector<4x1xf32> to vector<4x256xf32>
    %12 = arith.addf %10, %11 : vector<4x256xf32>
    %cst = arith.constant 0.000000e+00 : f32
    %13 = vector.broadcast %cst : f32 to vector<4x256xf32>
    %14 = arith.maximumf %12, %13 : vector<4x256xf32>
    %15 = vector.broadcast %0 : f32 to vector<4x256xf32>
    %16 = arith.mulf %15, %14 : vector<4x256xf32>
    %17 = vector.broadcast %1 : f32 to vector<4x256xf32>
    %18 = arith.addf %16, %17 : vector<4x256xf32>
    %19 = arith.truncf %18 : vector<4x256xf32> to vector<4x256xbf16>
    %c0_2 = arith.constant 0 : index
    %c0_3 = arith.constant 0 : index
    %20 = vector.load %arg5[%c0_2, %c0_3] : memref<4x256xbf16, #tpu.memory_space<vmem>>, vector<4x256xbf16>
    tpu.vector_store %arg5[%c0_2, %c0_3], %19 {strides = array<i32>} : memref<4x256xbf16, #tpu.memory_space<vmem>>, vector<4x256xbf16>,
    %21 = tpu.iota {dimensions = array<i32: 1>} : vector<1x256xi32>
    %c16_i32 = arith.constant 16 : i32
    %c0_i32 = arith.constant 0 : i32
    %22 = arith.cmpi eq, %c16_i32, %c0_i32 : i32
    %c1_i32 = arith.constant 1 : i32
    %23 = arith.select %22, %c1_i32, %c16_i32 : i32
    %24 = vector.broadcast %23 : i32 to vector<1x256xi32>
    %25 = arith.remsi %21, %24 : vector<1x256xi32>
    %c0_i32_4 = arith.constant 0 : i32
    %26 = vector.broadcast %c0_i32_4 : i32 to vector<1x256xi32>
    %27 = arith.cmpi ne, %25, %26 : vector<1x256xi32>
    %c0_i32_5 = arith.constant 0 : i32
    %28 = vector.broadcast %c0_i32_5 : i32 to vector<1x256xi32>
    %29 = arith.cmpi slt, %25, %28 : vector<1x256xi32>
    %c0_i32_6 = arith.constant 0 : i32
    %30 = arith.cmpi slt, %23, %c0_i32_6 : i32
    %31 = vector.broadcast %30 : i1 to vector<1x256xi1>
    %32 = vector.broadcast %31 : vector<1x256xi1> to vector<1x256xi1>
    %33 = arith.xori %29, %32 : vector<1x256xi1>
    %34 = arith.andi %33, %27 : vector<1x256xi1>
    %35 = vector.broadcast %23 : i32 to vector<1x256xi32>
    %36 = arith.addi %25, %35 : vector<1x256xi32>
    %37 = arith.select %34, %36, %25 : vector<1x256xi1>, vector<1x256xi32>
    %cst_7 = arith.constant 0.000000e+00 : f32
    %38 = vector.broadcast %cst_7 : f32 to vector<3x256xf32>
    %c0_8 = arith.constant 0 : index
    %c0_9 = arith.constant 0 : index
    %39 = vector.load %arg3[%c0_8, %c0_9] : memref<4x290xf32, #tpu.memory_space<vmem>>, vector<4x256xf32>
    %c1_i32_10 = arith.constant 1 : i32
    %40 = vector.broadcast %c1_i32_10 : i32 to vector<1x256xi32>
    %41 = arith.cmpi sge, %37, %40 : vector<1x256xi32>
    %cst_11 = arith.constant 0.000000e+00 : f32
    %42 = vector.shape_cast %41 : vector<1x256xi1> to vector<1x256xi1>
    %43 = vector.broadcast %42 : vector<1x256xi1> to vector<4x256xi1>
    %44 = vector.broadcast %cst_11 : f32 to vector<4x256xf32>
    %45 = arith.select %43, %39, %44 : vector<4x256xi1>, vector<4x256xf32>
    %c0_12 = arith.constant 0 : index
    %c0_13 = arith.constant 0 : index
    %46 = vector.load %arg4[%c0_12, %c0_13] : memref<27x4xbf16, #tpu.memory_space<vmem>>, vector<3x4xbf16>
    %47 = arith.truncf %45 : vector<4x256xf32> to vector<4x256xbf16>
    %cst_14 = arith.constant dense<0.000000e+00> : vector<3x256xf32>
    %48 = tpu.matmul %46, %47, %cst_14 {dimension_numbers = #tpu.dot_dimension_numbers<[1], [0], [0], [1], [0, 0, 1, 1], [], []>} : vector<3x4xbf16>, vector<4x256xbf16>, vector<3x256xf32> -> vector<3x256xf32>
    %49 = arith.addf %38, %48 : vector<3x256xf32>
    %c0_15 = arith.constant 0 : index
    %c1 = arith.constant 1 : index
    %50 = vector.load %arg3[%c0_15, %c1] : memref<4x290xf32, #tpu.memory_space<vmem>>, vector<4x256xf32>
    %c3_16 = arith.constant 3 : index
    %c0_17 = arith.constant 0 : index
    %51 = vector.load %arg4[%c3_16, %c0_17] : memref<27x4xbf16, #tpu.memory_space<vmem>>, vector<3x4xbf16>
    %52 = arith.truncf %50 : vector<4x256xf32> to vector<4x256xbf16>
    %cst_18 = arith.constant dense<0.000000e+00> : vector<3x256xf32>
    %53 = tpu.matmul %51, %52, %cst_18 {dimension_numbers = #tpu.dot_dimension_numbers<[1], [0], [0], [1], [0, 0, 1, 1], [], []>} : vector<3x4xbf16>, vector<4x256xbf16>, vector<3x256xf32> -> vector<3x256xf32>
    %54 = arith.addf %49, %53 : vector<3x256xf32>
    %c0_19 = arith.constant 0 : index
    %c2_20 = arith.constant 2 : index
    %55 = vector.load %arg3[%c0_19, %c2_20] : memref<4x290xf32, #tpu.memory_space<vmem>>, vector<4x256xf32>
    %c14_i32 = arith.constant 14 : i32
    %56 = vector.broadcast %c14_i32 : i32 to vector<1x256xi32>
    %57 = arith.cmpi sle, %37, %56 : vector<1x256xi32>
    %cst_21 = arith.constant 0.000000e+00 : f32
    %58 = vector.shape_cast %57 : vector<1x256xi1> to vector<1x256xi1>
    %59 = vector.broadcast %58 : vector<1x256xi1> to vector<4x256xi1>
    %60 = vector.broadcast %cst_21 : f32 to vector<4x256xf32>
    %61 = arith.select %59, %55, %60 : vector<4x256xi1>, vector<4x256xf32>
    %c6 = arith.constant 6 : index
    %c0_22 = arith.constant 0 : index
    %62 = vector.load %arg4[%c6, %c0_22] : memref<27x4xbf16, #tpu.memory_space<vmem>>, vector<3x4xbf16>
    %63 = arith.truncf %61 : vector<4x256xf32> to vector<4x256xbf16>
    %cst_23 = arith.constant dense<0.000000e+00> : vector<3x256xf32>
    %64 = tpu.matmul %62, %63, %cst_23 {dimension_numbers = #tpu.dot_dimension_numbers<[1], [0], [0], [1], [0, 0, 1, 1], [], []>} : vector<3x4xbf16>, vector<4x256xbf16>, vector<3x256xf32> -> vector<3x256xf32>
    %65 = arith.addf %54, %64 : vector<3x256xf32>
    %c0_24 = arith.constant 0 : index
    %c16 = arith.constant 16 : index
    %66 = vector.load %arg3[%c0_24, %c16] : memref<4x290xf32, #tpu.memory_space<vmem>>, vector<4x256xf32>
    %c1_i32_25 = arith.constant 1 : i32
    %67 = vector.broadcast %c1_i32_25 : i32 to vector<1x256xi32>
    %68 = arith.cmpi sge, %37, %67 : vector<1x256xi32>
    %cst_26 = arith.constant 0.000000e+00 : f32
    %69 = vector.shape_cast %68 : vector<1x256xi1> to vector<1x256xi1>
    %70 = vector.broadcast %69 : vector<1x256xi1> to vector<4x256xi1>
    %71 = vector.broadcast %cst_26 : f32 to vector<4x256xf32>
    %72 = arith.select %70, %66, %71 : vector<4x256xi1>, vector<4x256xf32>
    %c9 = arith.constant 9 : index
    %c0_27 = arith.constant 0 : index
    %73 = vector.load %arg4[%c9, %c0_27] : memref<27x4xbf16, #tpu.memory_space<vmem>>, vector<3x4xbf16>
    %74 = arith.truncf %72 : vector<4x256xf32> to vector<4x256xbf16>
    %cst_28 = arith.constant dense<0.000000e+00> : vector<3x256xf32>
    %75 = tpu.matmul %73, %74, %cst_28 {dimension_numbers = #tpu.dot_dimension_numbers<[1], [0], [0], [1], [0, 0, 1, 1], [], []>} : vector<3x4xbf16>, vector<4x256xbf16>, vector<3x256xf32> -> vector<3x256xf32>
    %76 = arith.addf %65, %75 : vector<3x256xf32>
    %c0_29 = arith.constant 0 : index
    %c17_30 = arith.constant 17 : index
    %77 = vector.load %arg3[%c0_29, %c17_30] : memref<4x290xf32, #tpu.memory_space<vmem>>, vector<4x256xf32>
    %c12 = arith.constant 12 : index
    %c0_31 = arith.constant 0 : index
    %78 = vector.load %arg4[%c12, %c0_31] : memref<27x4xbf16, #tpu.memory_space<vmem>>, vector<3x4xbf16>
    %79 = arith.truncf %77 : vector<4x256xf32> to vector<4x256xbf16>
    %cst_32 = arith.constant dense<0.000000e+00> : vector<3x256xf32>
    %80 = tpu.matmul %78, %79, %cst_32 {dimension_numbers = #tpu.dot_dimension_numbers<[1], [0], [0], [1], [0, 0, 1, 1], [], []>} : vector<3x4xbf16>, vector<4x256xbf16>, vector<3x256xf32> -> vector<3x256xf32>
    %81 = arith.addf %76, %80 : vector<3x256xf32>
    %c0_33 = arith.constant 0 : index
    %c18 = arith.constant 18 : index
    %82 = vector.load %arg3[%c0_33, %c18] : memref<4x290xf32, #tpu.memory_space<vmem>>, vector<4x256xf32>
    %c14_i32_34 = arith.constant 14 : i32
    %83 = vector.broadcast %c14_i32_34 : i32 to vector<1x256xi32>
    %84 = arith.cmpi sle, %37, %83 : vector<1x256xi32>
    %cst_35 = arith.constant 0.000000e+00 : f32
    %85 = vector.shape_cast %84 : vector<1x256xi1> to vector<1x256xi1>
    %86 = vector.broadcast %85 : vector<1x256xi1> to vector<4x256xi1>
    %87 = vector.broadcast %cst_35 : f32 to vector<4x256xf32>
    %88 = arith.select %86, %82, %87 : vector<4x256xi1>, vector<4x256xf32>
    %c15 = arith.constant 15 : index
    %c0_36 = arith.constant 0 : index
    %89 = vector.load %arg4[%c15, %c0_36] : memref<27x4xbf16, #tpu.memory_space<vmem>>, vector<3x4xbf16>
    %90 = arith.truncf %88 : vector<4x256xf32> to vector<4x256xbf16>
    %cst_37 = arith.constant dense<0.000000e+00> : vector<3x256xf32>
    %91 = tpu.matmul %89, %90, %cst_37 {dimension_numbers = #tpu.dot_dimension_numbers<[1], [0], [0], [1], [0, 0, 1, 1], [], []>} : vector<3x4xbf16>, vector<4x256xbf16>, vector<3x256xf32> -> vector<3x256xf32>
    %92 = arith.addf %81, %91 : vector<3x256xf32>
    %c0_38 = arith.constant 0 : index
    %c32 = arith.constant 32 : index
    %93 = vector.load %arg3[%c0_38, %c32] : memref<4x290xf32, #tpu.memory_space<vmem>>, vector<4x256xf32>
    %c1_i32_39 = arith.constant 1 : i32
    %94 = vector.broadcast %c1_i32_39 : i32 to vector<1x256xi32>
    %95 = arith.cmpi sge, %37, %94 : vector<1x256xi32>
    %cst_40 = arith.constant 0.000000e+00 : f32
    %96 = vector.shape_cast %95 : vector<1x256xi1> to vector<1x256xi1>
    %97 = vector.broadcast %96 : vector<1x256xi1> to vector<4x256xi1>
    %98 = vector.broadcast %cst_40 : f32 to vector<4x256xf32>
    %99 = arith.select %97, %93, %98 : vector<4x256xi1>, vector<4x256xf32>
    %c18_41 = arith.constant 18 : index
    %c0_42 = arith.constant 0 : index
    %100 = vector.load %arg4[%c18_41, %c0_42] : memref<27x4xbf16, #tpu.memory_space<vmem>>, vector<3x4xbf16>
    %101 = arith.truncf %99 : vector<4x256xf32> to vector<4x256xbf16>
    %cst_43 = arith.constant dense<0.000000e+00> : vector<3x256xf32>
    %102 = tpu.matmul %100, %101, %cst_43 {dimension_numbers = #tpu.dot_dimension_numbers<[1], [0], [0], [1], [0, 0, 1, 1], [], []>} : vector<3x4xbf16>, vector<4x256xbf16>, vector<3x256xf32> -> vector<3x256xf32>
    %103 = arith.addf %92, %102 : vector<3x256xf32>
    %c0_44 = arith.constant 0 : index
    %c33 = arith.constant 33 : index
    %104 = vector.load %arg3[%c0_44, %c33] : memref<4x290xf32, #tpu.memory_space<vmem>>, vector<4x256xf32>
    %c21 = arith.constant 21 : index
    %c0_45 = arith.constant 0 : index
    %105 = vector.load %arg4[%c21, %c0_45] : memref<27x4xbf16, #tpu.memory_space<vmem>>, vector<3x4xbf16>
    %106 = arith.truncf %104 : vector<4x256xf32> to vector<4x256xbf16>
    %cst_46 = arith.constant dense<0.000000e+00> : vector<3x256xf32>
    %107 = tpu.matmul %105, %106, %cst_46 {dimension_numbers = #tpu.dot_dimension_numbers<[1], [0], [0], [1], [0, 0, 1, 1], [], []>} : vector<3x4xbf16>, vector<4x256xbf16>, vector<3x256xf32> -> vector<3x256xf32>
    %108 = arith.addf %103, %107 : vector<3x256xf32>
    %c0_47 = arith.constant 0 : index
    %c34 = arith.constant 34 : index
    %109 = vector.load %arg3[%c0_47, %c34] : memref<4x290xf32, #tpu.memory_space<vmem>>, vector<4x256xf32>
    %c14_i32_48 = arith.constant 14 : i32
    %110 = vector.broadcast %c14_i32_48 : i32 to vector<1x256xi32>
    %111 = arith.cmpi sle, %37, %110 : vector<1x256xi32>
    %cst_49 = arith.constant 0.000000e+00 : f32
    %112 = vector.shape_cast %111 : vector<1x256xi1> to vector<1x256xi1>
    %113 = vector.broadcast %112 : vector<1x256xi1> to vector<4x256xi1>
    %114 = vector.broadcast %cst_49 : f32 to vector<4x256xf32>
    %115 = arith.select %113, %109, %114 : vector<4x256xi1>, vector<4x256xf32>
    %c24 = arith.constant 24 : index
    %c0_50 = arith.constant 0 : index
    %116 = vector.load %arg4[%c24, %c0_50] : memref<27x4xbf16, #tpu.memory_space<vmem>>, vector<3x4xbf16>
    %117 = arith.truncf %115 : vector<4x256xf32> to vector<4x256xbf16>
    %cst_51 = arith.constant dense<0.000000e+00> : vector<3x256xf32>
    %118 = tpu.matmul %116, %117, %cst_51 {dimension_numbers = #tpu.dot_dimension_numbers<[1], [0], [0], [1], [0, 0, 1, 1], [], []>} : vector<3x4xbf16>, vector<4x256xbf16>, vector<3x256xf32> -> vector<3x256xf32>
    %119 = arith.addf %108, %118 : vector<3x256xf32>
    %120 = vector.broadcast %7 : vector<3x1xf32> to vector<3x256xf32>
    %121 = arith.addf %119, %120 : vector<3x256xf32>
    %122 = vector.broadcast %2 : f32 to vector<3x256xf32>
    %123 = arith.mulf %122, %121 : vector<3x256xf32>
    %124 = vector.broadcast %3 : f32 to vector<3x256xf32>
    %125 = arith.addf %123, %124 : vector<3x256xf32>
    %126 = arith.truncf %125 : vector<3x256xf32> to vector<3x256xbf16>
    %c0_52 = arith.constant 0 : index
    %c0_53 = arith.constant 0 : index
    %127 = vector.load %arg6[%c0_52, %c0_53] : memref<3x256xbf16, #tpu.memory_space<vmem>>, vector<3x256xbf16>
    tpu.vector_store %arg6[%c0_52, %c0_53], %126 {strides = array<i32>} : memref<3x256xbf16, #tpu.memory_space<vmem>>, vector<3x256xbf16>,
    return
  }
  func.func @transform_0(%arg0: i32) -> i32 {
    %c0_i32 = arith.constant 0 : i32
    %c0_i32_0 = arith.constant 0 : i32
    return %c0_i32 : i32
  }
  func.func @transform_1(%arg0: i32) -> (i32, i32) {
    %c0_i32 = arith.constant 0 : i32
    %c0_i32_0 = arith.constant 0 : i32
    %c0_i32_1 = arith.constant 0 : i32
    return %c0_i32, %c0_i32_0 : i32, i32
  }
  func.func @transform_2(%arg0: i32) -> (i32, i32) {
    %c0_i32 = arith.constant 0 : i32
    %c0_i32_0 = arith.constant 0 : i32
    %c0_i32_1 = arith.constant 0 : i32
    return %c0_i32, %c0_i32_0 : i32, i32
  }
  func.func @transform_3(%arg0: i32) -> (i32, i32) {
    %c0_i32 = arith.constant 0 : i32
    %c0_i32_0 = arith.constant 0 : i32
    %c0_i32_1 = arith.constant 0 : i32
    return %c0_i32, %c0_i32_0 : i32, i32
  }
  func.func @transform_4(%arg0: i32) -> (i32, i32) {
    %c0_i32 = arith.constant 0 : i32
    %c0_i32_0 = arith.constant 0 : i32
    %c0_i32_1 = arith.constant 0 : i32
    return %c0_i32, %c0_i32_0 : i32, i32
  }
  func.func @transform_5(%arg0: i32) -> (i32, i32) {
    %c0_i32 = arith.constant 0 : i32
    %c0_i32_0 = arith.constant 0 : i32
    %c0_i32_1 = arith.constant 0 : i32
    return %c0_i32, %c0_i32_0 : i32, i32
  }
}

</mosaic_0001>

<bundles_post_ra>
// kernel: multi_head_attn_forward.3
= control target key start
LH: loop header
LB: loop body
LE: loop exit
PB: predicated region body
PF: predicated region fallthrough
CT: control target
= control target key end

     0   :  { %13 = vsyncpa [#allocation3], 0  ;;  %s1051_s24 = smov 0   ;;  %s1350_s0 = inlined_call_operand.vmem [shape: f32[6], index: 0, kind: input, shape index: {}]   ;;  %s1351_s1 = inlined_call_operand.vmem [shape: f32[24,1], index: 1, kind: input, shape index: {}]   ;;  %s1352_s2 = inlined_call_operand.vmem [shape: f32[4,256], index: 2, kind: input, shape index: {}]   ;;  %s1353_s3 = inlined_call_operand.vmem [shape: f32[8,256], index: 3, kind: input, shape index: {}, may-alias: {3,7}]   ;;  %s1354_s4 = inlined_call_operand.vmem [shape: bf16[4,256], index: 4, kind: input, shape index: {}]   ;;  %s1355_s5 = inlined_call_operand.vmem [shape: bf16[3,256], index: 5, kind: input, shape index: {}]   ;;  %s1356_s6 = inlined_call_operand.vmem [shape: f32[3,256], index: 6, kind: output, shape index: {0}]   ;;  %s1357_s7 = inlined_call_operand.vmem [shape: f32[8,256], index: 7, kind: output, shape index: {1}, may-alias: {3,7}]  }
   0x1 LB: > { %s1057_s25 = sadd.s32 4294967295, %s1007_s24   ;;  %p864_p0 = scmp.ge.s32.totalorder %s1007_s24, 1  ;;  %s1007_s24 = sphi %s1051_s24, %s19_s24  }
   0x2   : > { %p212_p1 = scmp.lt.s32.totalorder %s1007_s24, 3  ;;  %s224_s28 = sshll.u32 %s1350_s0, 4  ;;  %s225_s28 = int_to_ptr.vmem [resolvable:$true] %s224_s28 }
   0x3   : > { %p902_p3 = scmp.eq.s32.totalorder %s1057_s25, 0  ;;  %s1009_s29 = smov [#allocation2]  }
   0x4   : > { %p213_p2 = pnand %p864_p0, %p212_p1 }
   0x6   : > { %p898_p4 = pneg %p213_p2  ;;  %260 = sbr.rel (%p213_p2) target bundleno = 763 (0x2fb), region = 44 }
   0x8   : > { %p899_p5 = pnand %p902_p3, %p898_p4 }
   0xa   : > { %901 = dma.vmem_to_smem (!%p899_p5), %s225_s28, 16, %s1009_s29, [#allocation3]  }
   0xb   : > { %1002 = dma.done.wait (%p902_p3), [#allocation3], 16  }
   0xc   : > { %1004 = vsyncadd (%p902_p3), [#allocation3], 4294967280 }
   0xd   : > { %267 = sfence }
   0xe   : > { %v321_v0 = vld [vmem:[%s1351_s1 + $0x10] sm:$0xff]  ;;  %v320_v1 = vld [vmem:[%s1351_s1 + $0x8] sm:$0xff]  ;;  %v1010_v2 = vmov 0   ;;  %v358_v3 = vld [vmem:[%s1354_s4] sm:$0xf]  ;;  %p300_p6 = scmp.lt.s32.totalorder %s1057_s25, 1 }
   0xf   : > { %915 = vset.pattern.permute.xlu1 %v1010_v2  ;;  %914 = vset.pattern.permute.xlu0 %v1010_v2  ;;  %361 = vst [vmem:[#allocation1] ss:$4 sm:$0xff] %v358_v3  ;;  %v319_v4 = vld [vmem:[%s1351_s1] sm:$0xff]  ;;  %vm333_vm0 = vcmask 1043456   ;;  %s317_s27 = sld [smem:[#allocation2]]  ;;  %vm439_vm1 = vcmask 1041408  }
  0x10   : > { %326 = vperm.xlu0 %914, %v321_v0   ;;  %344 = vperm.xlu1 %915, %v320_v1   ;;  %v702_v5 = vld [vmem:[%s1355_s5] sm:$0xf]  ;;  %s1359_s25 = smov (!%p300_p6, %s1057_s25), 1  ;;  %s873_s28 = sld [smem:[#allocation2 + $0x1]]  ;;  %vm390_vm2 = vcmask 31744  }
  0x11   : > { %s869_s17 = sshll.u32 %s1359_s25, 2  ;;  %s870_s21 = sshll.u32 %s1359_s25, 3 }
  0x12   : > { %s303_s20 = scalar_lea.vmem %s1352_s2, %s869_s17  ;;  %s307_s26 = scalar_lea.vmem %s1353_s3, %s870_s21 }
  0x13   : > { %v322_v8 = vld [vmem:[%s303_s20] sm:$0xf]  ;;  %s315_s8 = scalar_lea.vmem %s1357_s7, %s870_s21  ;;  %s311_s11 = scalar_lea.vmem %s1356_s6, %s869_s17 }
  0x14   : > { %v323_v12 = vld [vmem:[%s307_s26] sm:$0xff] }
  0x15   : > { %v349_v19 = vstv %s317_s27 }
  0x16   : > { %v362_v6 = vld.sshfl [vmem:[#allocation1] sm:$0xff pattern:$0x73625140]  ;;  %v363_v7 = vld.sshfl [vmem:[#allocation1 + $0x8] sm:$0xff pattern:$0x73625140]  ;;  %v351_v21 = vstv %s873_s28 }
  0x17   : > { %720 = vst [vmem:[#allocation1] ss:$4 sm:$0xff] %v702_v5 }
  0x18   : > { %337 = vperm.xlu0 %914, %v319_v4  }
  0x45   : > { %366 = vxpose.binary.xlu1.c.b16.start.end [1/2] (short) %v363_v7, %v362_v6, 128 }
  0x82   : > { %v327_v9 = vpop.permute.xlu0 %326  ;;  %v345_v17 = vpop.permute.xlu1 %344 }
  0x83   : > { %v329_v10 = vmul.f32 %v327_v9, %v322_v8 }
  0x85   : > { %v331_v11 = vrot.slane %v329_v10, 4 }
  0x87   : > { %v334_v14 = vsel %vm333_vm0, %v329_v10, %v331_v11 }
  0x8a   : > { %v338_v13 = vpop.permute.xlu0 %337 }
  0x8b   : > { %v340_v15 = vmul.f32 %v338_v13, %v323_v12 }
  0x8d   : > { %v341_v16 = vadd.f32 %v340_v15, %v334_v14 }
  0x8f   : > { %v347_v18 = vadd.f32 %v345_v17, %v341_v16 }
  0x91   : > { %v348_v20 = vmax.f32 %v347_v18, 0.0 }
  0x93   : > { %v350_v22 = vmul.f32 %v349_v19, %v348_v20 }
  0x95   : > { %v352_v23 = vadd.f32 %v351_v21, %v350_v22 }
  0x97   : > { %353 = vst [vmem:[%s315_s8] sm:$0xff] %v352_v23  ;;  %v355_v24 = vrot.slane %v352_v23, 4 }
  0x99   : > { %v357_v25 = vadd.f32 %v355_v24, %v352_v23 }
  0x9b   : > { %v359_v26 = vpack.c.bf16 %v357_v25, %v357_v25 }
  0x9d   : > { %v441_v27 = vsel %vm439_vm1, %v359_v26, 0 }
  0x9e   : > { %450 = vmatpush.bf16.msra.mxu0 %v441_v27  ;;  %892 = vmatpush.bf16.msra.mxu1 %v441_v27 }
  0x9f   : > { %893 = vmatpush.bf16.msra.mxu3 %v441_v27 }
  0xf1   : > { %v374_v28 = vpop.trf.xlu1 }
  0xf2   : > { %874 = vmatmul.msk.bf16.vlgmr.msra.gmra.mxu0 %vm390_vm2, %v374_v28 }
  0xf9   : > { %v375_v29 = vpop.trf.xlu1 }
 0x101   : > { %v376_v30 = vpop.trf.xlu1 }
 0x102   : > { %875 = vmatmul.msk.bf16.gmra.mxu0 %vm390_vm2, %v376_v30 }
 0x109   : > { %v377_v31 = vpop.trf.xlu1 }
 0x111   : > { %v378_v32 = vpop.trf.xlu1 }
 0x112   : > { %876 = vmatmul.msk.bf16.gmra.mxu0 %vm390_vm2, %v378_v32 }
 0x119   : > { %v379_v33 = vpop.trf.xlu1 }
 0x121   : > { %v380_v34 = vpop.trf.xlu1 }
 0x122   : > { %877 = vmatmul.msk.bf16.gmra.mxu0 %vm390_vm2, %v380_v34 }
 0x129   : > { %v381_v35 = vpop.trf.xlu1 }
 0x12a   : > { %885 = vmatmul.msk.bf16.vlgmr.msra.gmra.mxu3 %vm390_vm2, %v381_v35 }
 0x131   : > { %v382_v36 = vpop.trf.xlu1 }
 0x132   : > { %878 = vmatmul.msk.bf16.gmra.mxu0 %vm390_vm2, %v382_v36 }
 0x139   : > { %v383_v37 = vpop.trf.xlu1 }
 0x13a   : > { %886 = vmatmul.msk.bf16.gmra.mxu3 %vm390_vm2, %v383_v37 }
 0x141   : > { %v384_v38 = vpop.trf.xlu1 }
 0x142   : > { %879 = vmatmul.msk.bf16.gmra.mxu0 %vm390_vm2, %v384_v38 }
 0x149   : > { %v385_v39 = vpop.trf.xlu1 }
 0x14a   : > { %887 = vmatmul.msk.bf16.gmra.mxu3 %vm390_vm2, %v385_v39 }
 0x151   : > { %v386_v40 = vpop.trf.xlu1 }
 0x152   : > { %880 = vmatmul.msk.bf16.vlgmr.msra.gmra.mxu1 %vm390_vm2, %v386_v40 }
 0x159   : > { %v387_v41 = vpop.trf.xlu1 }
 0x15a   : > { %888 = vmatmul.msk.bf16.gmra.mxu3 %vm390_vm2, %v387_v41 }
 0x161   : > { %v388_v42 = vpop.trf.xlu1 }
 0x162   : > { %881 = vmatmul.msk.bf16.gmra.mxu1 %vm390_vm2, %v388_v42 }
 0x169   : > { %v389_v43 = vpop.trf.xlu1 }
 0x16a   : > { %889 = vmatmul.msk.bf16.gmra.mxu3 %vm390_vm2, %v389_v43 }
 0x16f   : > { %v1113_v44 = vpop.f32.mrf.mxu0 }
 0x172   : > { %882 = vmatmul.msk.bf16.gmra.mxu1 %vm390_vm2, %v375_v29 }
 0x177   : > { %v1115_v45 = vpop.f32.mrf.mxu0 }
 0x17f   : > { %v1117_v46 = vpop.f32.mrf.mxu0 }
 0x182   : > { %883 = vmatmul.msk.bf16.gmra.mxu1 %vm390_vm2, %v377_v31 }
 0x187   : > { %v1119_v47 = vpop.f32.mrf.mxu0 }
 0x18f   : > { %v1123_v49 = vpop.f32.mrf.mxu0 }
 0x190   : > { %v532_v11 = vmax.f32 %v1113_v44, %v1123_v49 }
 0x192   : > { %884 = vmatmul.msk.bf16.gmra.mxu1 %vm390_vm2, %v379_v33 }
 0x197   : > { %v1127_v51 = vpop.f32.mrf.mxu0 }
 0x198   : > { %v533_v19 = vmax.f32 %v1115_v45, %v1127_v51 }
 0x19f   : > { %v1133_v54 = vpop.f32.mrf.mxu0 }
 0x1a0   : > { %v534_v9 = vmax.f32 %v1117_v46, %v1133_v54 }
 0x1a7   : > { %v1139_v57 = vpop.f32.mrf.mxu0 }
 0x1a8   : > { %v535_v8 = vmax.f32 %v1119_v47, %v1139_v57 }
 0x1ad   : > { %v1121_v48 = vpop.f32.mrf.mxu3 }
 0x1af   : > { %v1147_v61 = vpop.f32.mrf.mxu0 }
 0x1b0   : > { %v536_v15 = vmax.f32 %v532_v11, %v1147_v61 }
 0x1b5   : > { %v1125_v50 = vpop.f32.mrf.mxu3 }
 0x1b7   : > { %v1153_v0 = vpop.f32.mrf.mxu0 }
 0x1b8   : > { %v537_v22 = vmax.f32 %v533_v19, %v1153_v0 }
 0x1bd   : > { %v1131_v53 = vpop.f32.mrf.mxu3 }
 0x1bf   : > { %v1159_v3 = vpop.f32.mrf.mxu0 }
 0x1c0   : > { %v538_v12 = vmax.f32 %v534_v9, %v1159_v3 }
 0x1c5   : > { %v1137_v56 = vpop.f32.mrf.mxu3 }
 0x1c7   : > { %v1165_v6 = vpop.f32.mrf.mxu0 }
 0x1c8   : > { %v539_v10 = vmax.f32 %v535_v8, %v1165_v6 }
 0x1cd   : > { %v1143_v59 = vpop.f32.mrf.mxu3 }
 0x1cf   : > { %v1129_v52 = vpop.f32.mrf.mxu1 }
 0x1d0   : > { %v540_v20 = vmax.f32 %v536_v15, %v1129_v52 }
 0x1d5   : > { %v1151_v63 = vpop.f32.mrf.mxu3 }
 0x1d7   : > { %v1135_v55 = vpop.f32.mrf.mxu1 }
 0x1d8   : > { %v541_v25 = vmax.f32 %v537_v22, %v1135_v55 }
 0x1dd   : > { %v1157_v2 = vpop.f32.mrf.mxu3 }
 0x1df   : > { %v1141_v58 = vpop.f32.mrf.mxu1 }
 0x1e0   : > { %v542_v16 = vmax.f32 %v538_v12, %v1141_v58 }
 0x1e5   : > { %v1163_v5 = vpop.f32.mrf.mxu3 }
 0x1e7   : > { %v1145_v60 = vpop.f32.mrf.mxu1 }
 0x1e8   : > { %v543_v13 = vmax.f32 %v539_v10, %v1145_v60 }
 0x1ed   : > { %v1178_v14 = vpop.f32.mrf.mxu3 }
 0x1ef   : > { %v1149_v62 = vpop.f32.mrf.mxu1 }
 0x1f0   : > { %v544_v23 = vmax.f32 %v540_v20, %v1149_v62 }
 0x1f5   : > { %v1197_v30 = vpop.f32.mrf.mxu3 }
 0x1f7   : > { %v1155_v1 = vpop.f32.mrf.mxu1 }
 0x1f8   : > { %v545_v28 = vmax.f32 %v541_v25, %v1155_v1 }
 0x1ff   : > { %v1161_v4 = vpop.f32.mrf.mxu1 }
 0x200   : > { %v546_v21 = vmax.f32 %v542_v16, %v1161_v4 }
 0x202   : > { %v550_v26 = vmax.f32 %v546_v21, %v1121_v48 }
 0x204   : > { %v554_v32 = vmax.f32 %v550_v26, %v1143_v59 }
 0x206   : > { %v558_v37 = vmax.f32 %v554_v32, %v1178_v14 }
 0x207   : > { %v1167_v7 = vpop.f32.mrf.mxu1 }
 0x208   : > { %v547_v17 = vmax.f32 %v543_v13, %v1167_v7 }
 0x20a   : > { %v551_v24 = vmax.f32 %v547_v17, %v1125_v50 }
 0x20c   : > { %v555_v29 = vmax.f32 %v551_v24, %v1151_v63 }
 0x20e   : > { %v559_v35 = vmax.f32 %v555_v29, %v1197_v30 }
 0x20f   : > { %v1183_v18 = vpop.f32.mrf.mxu1 }
 0x210   : > { %v548_v27 = vmax.f32 %v544_v23, %v1183_v18  ;;  %v561_v40 = vmax.f32 %v558_v37, %v559_v35 }
 0x212   : > { %v552_v33 = vmax.f32 %v548_v27, %v1131_v53 }
 0x214   : > { %v556_v38 = vmax.f32 %v552_v33, %v1157_v2 }
 0x217   : > { %v1199_v31 = vpop.f32.mrf.mxu1 }
 0x218   : > { %v549_v34 = vmax.f32 %v545_v28, %v1199_v31 }
 0x21a   : > { %v553_v36 = vmax.f32 %v549_v34, %v1137_v56 }
 0x21c   : > { %v557_v39 = vmax.f32 %v553_v36, %v1163_v5 }
 0x21e   : > { %v560_v41 = vmax.f32 %v556_v38, %v557_v39 }
 0x220   : > { %v562_v42 = vmax.f32 %v560_v41, %v561_v40 }
 0x222   : > { %v563_v43 = vrot.slane %v562_v42, 4 }
 0x224   : > { %v564_v8 = vmax.f32 %v562_v42, %v563_v43 }
 0x226   : > { %v565_v9 = vrot.slane %v564_v8, 2 }
 0x228   : > { %v566_v10 = vmax.f32 %v564_v8, %v565_v9 }
 0x22a   : > { %v567_v11 = vrot.slane %v566_v10, 1 }
 0x22c   : > { %v1209_v12 = vmax.f32 %v566_v10, %v567_v11 }
 0x22e   : > { %v569_v13 = vsub.f32 %v1113_v44, %v1209_v12  ;;  %v570_v15 = vsub.f32 %v1115_v45, %v1209_v12  ;;  %v571_v16 = vsub.f32 %v1117_v46, %v1209_v12  ;;  %v572_v17 = vsub.f32 %v1119_v47, %v1209_v12 }
 0x22f   : > { %v573_v21 = vsub.f32 %v1123_v49, %v1209_v12  ;;  %v574_v23 = vsub.f32 %v1127_v51, %v1209_v12  ;;  %v575_v44 = vsub.f32 %v1133_v54, %v1209_v12  ;;  %v576_v46 = vsub.f32 %v1139_v57, %v1209_v12 }
 0x230   : > { %v601_v19 = vmul.f32 1.442695, %v569_v13  ;;  %v603_v20 = vmul.f32 1.442695, %v570_v15  ;;  %v605_v22 = vmul.f32 1.442695, %v571_v16  ;;  %v577_v47 = vsub.f32 %v1147_v61, %v1209_v12 }
 0x231   : > { %v607_v45 = vmul.f32 1.442695, %v572_v17  ;;  %v609_v24 = vmul.f32 1.442695, %v573_v21  ;;  %v578_v49 = vsub.f32 %v1153_v0, %v1209_v12  ;;  %v611_v25 = vmul.f32 1.442695, %v574_v23 }
 0x232   : > { %916 = vpow2.f32 %v601_v19  ;;  %v579_v51 = vsub.f32 %v1159_v3, %v1209_v12  ;;  %v613_v26 = vmul.f32 1.442695, %v575_v44  ;;  %v583_v27 = vsub.f32 %v1141_v58, %v1209_v12 }
 0x233   : > { %918 = vpow2.f32 %v603_v20  ;;  %v615_v57 = vmul.f32 1.442695, %v576_v46  ;;  %v584_v61 = vsub.f32 %v1145_v60, %v1209_v12  ;;  %v617_v29 = vmul.f32 1.442695, %v577_v47 }
 0x234   : > { %920 = vpow2.f32 %v605_v22  ;;  %v581_v0 = vsub.f32 %v1129_v52, %v1209_v12  ;;  %v619_v3 = vmul.f32 1.442695, %v578_v49  ;;  %v582_v58 = vsub.f32 %v1135_v55, %v1209_v12 }
 0x235   : > { %922 = vpow2.f32 %v607_v45  ;;  %v621_v34 = vmul.f32 1.442695, %v579_v51  ;;  %v587_v60 = vsub.f32 %v1161_v4, %v1209_v12  ;;  %v629_v35 = vmul.f32 1.442695, %v583_v27 }
 0x236   : > { %924 = vpow2.f32 %v609_v24  ;;  %v588_v37 = vsub.f32 %v1167_v7, %v1209_v12  ;;  %v631_v38 = vmul.f32 1.442695, %v584_v61  ;;  %v625_v39 = vmul.f32 1.442695, %v581_v0 }
 0x237   : > { %926 = vpow2.f32 %v611_v25  ;;  %v580_v4 = vsub.f32 %v1165_v6, %v1209_v12  ;;  %v627_v41 = vmul.f32 1.442695, %v582_v58  ;;  %v637_v43 = vmul.f32 1.442695, %v587_v60 }
 0x238   : > { %v1233_v54 = vpop.eup %916  ;;  %928 = vpow2.f32 %v613_v26  ;;  %v639_v9 = vmul.f32 1.442695, %v588_v37  ;;  %v585_v20 = vsub.f32 %v1149_v62, %v1209_v12  ;;  %v586_v23 = vsub.f32 %v1155_v1, %v1209_v12 }
 0x239   : > { %v1237_v28 = vpop.eup %918  ;;  %930 = vpow2.f32 %v615_v57  ;;  %v623_v6 = vmul.f32 1.442695, %v580_v4  ;;  %v599_v46 = vsub.f32 %v1178_v14, %v1209_v12  ;;  %v600_v49 = vsub.f32 %v1197_v30, %v1209_v12 }
 0x23a   : > { %v665_v32 = vadd.f32 %v1237_v28, %v1233_v54  ;;  %v1245_v33 = vpop.eup %920  ;;  %932 = vpow2.f32 %v617_v29  ;;  %v633_v62 = vmul.f32 1.442695, %v585_v20  ;;  %v597_v1 = vsub.f32 %v1157_v2, %v1209_v12 }
 0x23b   : > { %v1252_v52 = vpop.eup %922  ;;  %934 = vpow2.f32 %v619_v3  ;;  %v635_v27 = vmul.f32 1.442695, %v586_v23  ;;  %v598_v14 = vsub.f32 %v1163_v5, %v1209_v12  ;;  %v661_v61 = vmul.f32 1.442695, %v599_v46 }
 0x23c   : > { %v666_v36 = vadd.f32 %v1245_v33, %v665_v32  ;;  %v1257_v40 = vpop.eup %924  ;;  %936 = vpow2.f32 %v621_v34  ;;  %v663_v3 = vmul.f32 1.442695, %v600_v49  ;;  %v595_v32 = vsub.f32 %v1143_v59, %v1209_v12 }
 0x23d   : > { %v1261_v42 = vpop.eup %926  ;;  %938 = vpow2.f32 %v629_v35  ;;  %v657_v58 = vmul.f32 1.442695, %v597_v1  ;;  %v596_v34 = vsub.f32 %v1151_v63, %v1209_v12  ;;  %v659_v5 = vmul.f32 1.442695, %v598_v14 }
 0x23e   : > { %v667_v55 = vadd.f32 %v1252_v52, %v666_v36  ;;  %v1264_v7 = vpop.eup %928  ;;  %940 = vpow2.f32 %v631_v38  ;;  %v589_v60 = vsub.f32 %v1183_v18, %v1209_v12  ;;  %v590_v37 = vsub.f32 %v1199_v31, %v1209_v12 }
 0x23f   : > { %v1266_v10 = vpop.eup %930  ;;  %942 = vpow2.f32 %v625_v39  ;;  %v593_v59 = vsub.f32 %v1131_v53, %v1209_v12  ;;  %v653_v38 = vmul.f32 1.442695, %v595_v32  ;;  %v594_v63 = vsub.f32 %v1137_v56, %v1209_v12 }
 0x240   : > { %v668_v8 = vadd.f32 %v1257_v40, %v667_v55  ;;  %v1269_v13 = vpop.eup %932  ;;  %944 = vpow2.f32 %v627_v41  ;;  %v655_v55 = vmul.f32 1.442695, %v596_v34  ;;  %v641_v4 = vmul.f32 1.442695, %v589_v60 }
 0x241   : > { %v1271_v15 = vpop.eup %934  ;;  %946 = vpow2.f32 %v637_v43  ;;  %v591_v53 = vsub.f32 %v1121_v48, %v1209_v12  ;;  %v722_v60 = vld.sshfl [vmem:[#allocation1 + $0x8] sm:$0xff pattern:$0x73625140] }
 0x242   : > { %v669_v11 = vadd.f32 %v1261_v42, %v668_v8  ;;  %v937_v17 = vpop.eup %936  ;;  %948 = vpow2.f32 %v639_v9  ;;  %v707_v31 = vpack.c.bf16 %v1271_v15, %v1269_v13  ;;  %v643_v8 = vmul.f32 1.442695, %v590_v37 }
 0x243   : > { %v939_v19 = vpop.eup %938  ;;  %950 = vpow2.f32 %v623_v6 }
 0x244   : > { %v670_v16 = vadd.f32 %v1264_v7, %v669_v11  ;;  %v941_v22 = vpop.eup %940  ;;  %952 = vpow2.f32 %v633_v62  ;;  %v649_v11 = vmul.f32 1.442695, %v593_v59 }
 0x245   : > { %v943_v44 = vpop.eup %942  ;;  %v710_v47 = vpack.c.bf16 %v941_v22, %v939_v19  ;;  %954 = vpow2.f32 %v635_v27 }
 0x246   : > { %v671_v21 = vadd.f32 %v1266_v10, %v670_v16  ;;  %v945_v24 = vpop.eup %944  ;;  %956 = vpow2.f32 %v661_v61  ;;  %v592_v16 = vsub.f32 %v1125_v50, %v1209_v12 }
 0x247   : > { %v1284_v25 = vpop.eup %946  ;;  %725 = vmatpush.bf16.msrb.mxu1 %v710_v47  ;;  %v709_v29 = vpack.c.bf16 %v945_v24, %v943_v44  ;;  %958 = vpow2.f32 %v663_v3 }
 0x248   : > { %v672_v45 = vadd.f32 %v1269_v13, %v671_v21  ;;  %v1289_v26 = vpop.eup %948  ;;  %960 = vpow2.f32 %v657_v58  ;;  %v645_v21 = vmul.f32 1.442695, %v591_v53  ;;  %v647_v50 = vmul.f32 1.442695, %v592_v16 }
 0x249   : > { %v712_v30 = vpack.c.bf16 %v1289_v26, %v1284_v25  ;;  %v951_v0 = vpop.eup %950  ;;  %962 = vpow2.f32 %v659_v5 }
 0x24a   : > { %v673_v51 = vadd.f32 %v1271_v15, %v672_v45  ;;  %v708_v36 = vpack.c.bf16 %v951_v0, %v937_v17  ;;  %v1307_v18 = vpop.eup %952  ;;  %964 = vpow2.f32 %v653_v38  ;;  %v705_v45 = vpack.c.bf16 %v1261_v42, %v1257_v40 }
 0x24b   : > { %726 = vmatpush.bf16.msrb.mxu1 %v709_v29  ;;  %v1311_v43 = vpop.eup %954  ;;  %966 = vpow2.f32 %v655_v55 }
 0x24c   : > { %v674_v57 = vadd.f32 %v937_v17, %v673_v51  ;;  %v1315_v9 = vpop.eup %956  ;;  %v651_v17 = vmul.f32 1.442695, %v594_v63  ;;  %968 = vpow2.f32 %v641_v4  ;;  %v704_v51 = vpack.c.bf16 %v1252_v52, %v1245_v33 }
 0x24d   : > { %v1317_v6 = vpop.eup %958  ;;  %970 = vpow2.f32 %v643_v8 }
 0x24e   : > { %v675_v2 = vadd.f32 %v951_v0, %v674_v57  ;;  %v961_v13 = vpop.eup %960  ;;  %v718_v48 = vpack.c.bf16 %v1317_v6, %v1315_v9  ;;  %972 = vpow2.f32 %v649_v11  ;;  %v703_v57 = vpack.c.bf16 %v1237_v28, %v1233_v54  ;;  %v721_v0 = vld.sshfl [vmem:[#allocation1] sm:$0xff pattern:$0x73625140] }
 0x24f   : > { %727 = vmatpush.bf16.msrb.mxu1 %v708_v36  ;;  %v963_v20 = vpop.eup %962  ;;  %974 = vpow2.f32 %v651_v17  ;;  %v711_v28 = vpack.c.bf16 %v1311_v43, %v1307_v18 }
 0x250   : > { %v676_v35 = vadd.f32 %v943_v44, %v675_v2  ;;  %738 = vmatpush.bf16.msra.mxu2 %v718_v48  ;;  %v965_v12 = vpop.eup %964  ;;  %v717_v44 = vpack.c.bf16 %v963_v20, %v961_v13  ;;  %976 = vpow2.f32 %v645_v21 }
 0x251   : > { %v967_v46 = vpop.eup %966  ;;  %978 = vpow2.f32 %v647_v50 }
 0x252   : > { %v677_v39 = vadd.f32 %v945_v24, %v676_v35  ;;  %v716_v62 = vpack.c.bf16 %v967_v46, %v965_v12 }
 0x253   : > { %728 = vmatpush.bf16.msrb.mxu1 %v707_v31 }
 0x254   : > { %v678_v41 = vadd.f32 %v939_v19, %v677_v39  ;;  %v706_v19 = vpack.c.bf16 %v1266_v10, %v1264_v7  ;;  %v969_v7 = vpop.eup %968  ;;  %739 = vmatpush.bf16.msra.mxu2 %v717_v44 }
 0x255   : > { %v971_v47 = vpop.eup %970 }
 0x256   : > { %v679_v56 = vadd.f32 %v941_v22, %v678_v41  ;;  %v973_v24 = vpop.eup %972  ;;  %v713_v52 = vpack.c.bf16 %v971_v47, %v969_v7 }
 0x257   : > { %729 = vmatpush.bf16.msrb.mxu1 %v706_v19  ;;  %v975_v1 = vpop.eup %974 }
 0x258   : > { %v680_v15 = vadd.f32 %v1307_v18, %v679_v56  ;;  %740 = vmatpush.bf16.msra.mxu2 %v716_v62  ;;  %v977_v40 = vpop.eup %976  ;;  %v715_v14 = vpack.c.bf16 %v975_v1, %v973_v24 }
 0x259   : > { %v979_v61 = vpop.eup %978 }
 0x25a   : > { %v681_v22 = vadd.f32 %v1311_v43, %v680_v15  ;;  %v714_v32 = vpack.c.bf16 %v979_v61, %v977_v40 }
 0x25b   : > { %730 = vmatpush.bf16.msrb.mxu1 %v705_v45 }
 0x25c   : > { %v682_v23 = vadd.f32 %v1284_v25, %v681_v22  ;;  %741 = vmatpush.bf16.msra.mxu2 %v715_v14 }
 0x25e   : > { %v683_v10 = vadd.f32 %v1289_v26, %v682_v23 }
 0x25f   : > { %731 = vmatpush.bf16.msrb.mxu1 %v704_v51 }
 0x260   : > { %v684_v49 = vadd.f32 %v969_v7, %v683_v10  ;;  %742 = vmatpush.bf16.msra.mxu2 %v714_v32 }
 0x262   : > { %v685_v27 = vadd.f32 %v971_v47, %v684_v49 }
 0x263   : > { %732 = vmatpush.bf16.msrb.mxu1 %v703_v57 }
 0x264   : > { %v686_v42 = vadd.f32 %v977_v40, %v685_v27  ;;  %743 = vmatpush.bf16.msra.mxu2 %v713_v52 }
 0x266   : > { %v687_v29 = vadd.f32 %v979_v61, %v686_v42  ;;  %733 = vmatmul.bf16.vlgmr.msrb.gmra.mxu1 %v721_v0 }
 0x268   : > { %v688_v3 = vadd.f32 %v973_v24, %v687_v29  ;;  %744 = vmatpush.bf16.msra.mxu2 %v712_v30 }
 0x26a   : > { %v689_v2 = vadd.f32 %v975_v1, %v688_v3 }
 0x26c   : > { %v690_v33 = vadd.f32 %v965_v12, %v689_v2  ;;  %745 = vmatpush.bf16.msra.mxu2 %v711_v28 }
 0x26e   : > { %v691_v58 = vadd.f32 %v967_v46, %v690_v33 }
 0x26f   : > { %746 = vmatmul.bf16.vlgmr.msra.gmra.mxu2 %v722_v60 }
 0x270   : > { %v692_v34 = vadd.f32 %v961_v13, %v691_v58 }
 0x272   : > { %v693_v54 = vadd.f32 %v963_v20, %v692_v34 }
 0x274   : > { %v694_v5 = vadd.f32 %v1315_v9, %v693_v54 }
 0x276   : > { %v695_v35 = vadd.f32 %v1317_v6, %v694_v5 }
 0x278   : > { %v696_v36 = vrot.slane %v695_v35, 4 }
 0x27a   : > { %v697_v37 = vadd.f32 %v696_v36, %v695_v35 }
 0x27c   : > { %v698_v38 = vrot.slane %v697_v37, 2 }
 0x27e   : > { %v699_v39 = vadd.f32 %v698_v38, %v697_v37 }
 0x280   : > { %v700_v25 = vrot.slane %v699_v39, 1 }
 0x282   : > { %v701_v26 = vadd.f32 %v700_v25, %v699_v39 }
 0x284   : > { %980 = vrcp.f32 %v701_v26 }
 0x28a   : > { %v981_v18 = vpop.eup %980 }
 0x2e3   : > { %v734_v59 = vpop.f32.mrf.mxu1 }
 0x2eb   : > { %v736_v63 = vpop.f32.mrf.mxu1 }
 0x2f2   : > { %v747_v30 = vpop.f32.mrf.mxu2 }
 0x2f3   : > { %v748_v55 = vadd.f32 %v747_v30, %v734_v59 }
 0x2f5   : > { %v752_v4 = vmul.f32 %v981_v18, %v748_v55 }
 0x2f7   : > { %753 = vst [vmem:[%s311_s11] sm:$0x7] %v752_v4 }
 0x2fa   : > { %v749_v41 = vpop.f32.mrf.mxu2 }
 0x2fb PF: > { %s19_s24 = sadd.s32 1, %s1007_s24  }
 0x2fc   : > { %p16_p7 = scmp.ge.s32.totalorder %s19_s24, 4  }
 0x2fe   :  { %18 = sbr.rel (!%p16_p7) target bundleno = 1 (0x1), region = 94 }
 0x303   :  { %787 = vsyncpa [#allocation3], 1 }
 0x304   :  { %789 = vsyncpa [#allocation3 + $0x1], 1 }

// kernel: multi_head_attn_forward.2
= control target key start
LH: loop header
LB: loop body
LE: loop exit
PB: predicated region body
PF: predicated region fallthrough
CT: control target
= control target key end

     0   :  { %11 = vsyncpa [#allocation3], 0  ;;  %s874_s21 = smov [#allocation2]   ;;  %s1131_s0 = inlined_call_operand.vmem [shape: f32[6], index: 0, kind: input, shape index: {}]   ;;  %s1132_s1 = inlined_call_operand.vmem [shape: f32[24,1], index: 1, kind: input, shape index: {}]   ;;  %s1133_s2 = inlined_call_operand.vmem [shape: f32[4,290], index: 2, kind: input, shape index: {}]   ;;  %s1134_s3 = inlined_call_operand.vmem [shape: bf16[27,4], index: 3, kind: input, shape index: {}]   ;;  %s1135_s4 = inlined_call_operand.vmem [shape: bf16[4,256], index: 4, kind: output, shape index: {0}]   ;;  %s1136_s5 = inlined_call_operand.vmem [shape: bf16[3,256], index: 5, kind: output, shape index: {1}]  }
   0x1   :  { %s17_s20 = sshll.u32 %s1131_s0, 4  ;;  %s18_s20 = int_to_ptr.vmem [resolvable:$true] %s17_s20 }
   0x2   :  { %20 = dma.vmem_to_smem %s18_s20, 16, %s874_s21, [#allocation3]  }
   0x3   :  { %872 = dma.done.wait [#allocation3], 16  }
   0x4   :  { %873 = vsyncadd [#allocation3], 4294967280 }
   0x5   :  { %31 = sfence }
   0x6   :  { %v41_v0 = vld [vmem:[%s1133_s2 + $0x8] sm:$0xf]  ;;  %v923_v1 = vld [vmem:[%s1133_s2] sm:$0xff]  ;;  %s875_s29 = smov 127   ;;  %s876_s7 = smov 126   ;;  %v92_v53 = vlaneseq  ;;  %vm86_vm2 = vcmask 1041408  }
   0x7   :  { %51 = vst [vmem:[#allocation1 + $0x10] ss:$2 sm:$0xff] %v41_v0  ;;  %v138_v2 = vld [vmem:[%s1133_s2 + $0x8] sm:$0xf]  ;;  %s877_s12 = smov 112   ;;  %s878_s15 = smov 111  }
   0x8   :  { %49 = vst [vmem:[#allocation1] ss:$2 sm:$0xff] %v923_v1  ;;  %v249_v6 = vld [vmem:[%s1133_s2 + $0x8] sm:$0xf]  ;;  %s879_s18 = smov 110   ;;  %s880_s21 = smov 96  }
   0x9   :  { %v325_v11 = vld [vmem:[%s1133_s2 + $0x8] sm:$0xf]  ;;  %s881_s22 = smov 95   ;;  %v93_v54 = vand.u32 127, %v92_v53  ;;  %vm177_vm3 = vcmask 31744   ;;  %vm340_vm4 = vcmask 916480  }
   0xa   :  { %v398_v16 = vld [vmem:[%s1133_s2 + $0x8] sm:$0xf]  ;;  %vm174_vm5 = vcmask 1039360   ;;  %vm270_vm7 = vcmask 1031168   ;;  %v820_v53 = vld [vmem:[%s1134_s3] sm:$0x10] }
   0xb   :  { %v468_v22 = vld [vmem:[%s1133_s2 + $0x8] sm:$0xf]  ;;  %v94_v55 = vadd.s32 128, %v93_v54  ;;  %v99_v56 = vand.u32 15, %v93_v54  ;;  %vm61_vm9 = vcmask 908288   ;;  %vm483_vm10 = vcmask 900096  }
   0xc   :  { %v545_v27 = vld [vmem:[%s1133_s2 + $0x8] sm:$0xf]  ;;  %vm704_vm11 = vcmask 769024   ;;  %vm560_vm12 = vcmask 785408   ;;  %vm648_vm13 = vcmask 777216   ;;  %s791_s23 = sld [smem:[#allocation2 + $0x3]] }
   0xd   :  { %v612_v34 = vld [vmem:[%s1133_s2 + $0x8] sm:$0xf]  ;;  %v106_v57 = vand.u32 15, %v94_v55  ;;  %vm978_vm0 = vcmp.ge.s32.totalorder %v99_v56, 1  ;;  %vm1010_vm6 = vcmp.le.s32.totalorder %v99_v56, 14  ;;  %s792_s26 = sld [smem:[#allocation2 + $0x4]] }
   0xe   :  { %v929_v3 = vld.sshfl [vmem:[#allocation1 + $0x10] sm:$0xff pattern:$0x75316420]  ;;  %v689_v39 = vld [vmem:[%s1133_s2 + $0x8] sm:$0xf]  ;;  %s882_s2 = smov 94  }
   0xf   :  { %144 = vst [vmem:[#allocation1 + $0x10] ss:$2 sm:$0xff] %v138_v2  ;;  %v931_v4 = vld.sshfl [vmem:[#allocation1] sm:$0xff pattern:$0x75316420]  ;;  %vm982_vm1 = vcmp.ge.s32.totalorder %v106_v57, 1 }
  0x10   :  { %v933_v5 = vld.sshfl [vmem:[#allocation1 + $0x8] sm:$0xff pattern:$0x75316420]  ;;  %v134_v2 = vld [vmem:[%s1134_s3] sm:$0x3]  ;;  %vm1014_vm8 = vcmp.le.s32.totalorder %v106_v57, 14 }
  0x11   :  { %127 = vst [vmem:[#allocation1] ss:$2 sm:$0xff] %v923_v1  ;;  %vm772_vm14 = vsmask.f32 1280  ;;  %vm774_vm15 = vcmask 1043458  }
  0x16   :  { %v147_v7 = vld.sshfl [vmem:[#allocation1 + $0x10] sm:$0xff pattern:$0x75316420] }
  0x17   :  { %v153_v8 = vpack.c.bf16 %v147_v7, %v147_v7  ;;  %260 = vst [vmem:[#allocation1 + $0x10] ss:$2 sm:$0xff] %v249_v6  ;;  %v139_v7 = vld [vmem:[%s1134_s3] sm:$0x6] }
  0x18   :  { %v939_v9 = vld.sshfl [vmem:[#allocation1] sm:$0xff pattern:$0x75316420]  ;;  %v941_v10 = vld.sshfl [vmem:[#allocation1 + $0x8] sm:$0xff pattern:$0x75316420] }
  0x19   :  { %172 = vrot.lane.b32.xlu1 %v153_v8, %s875_s29  ;;  %142 = vst [vmem:[#allocation1] ss:$2 sm:$0xff] %v923_v1  ;;  %v132_v60 = vsel %vm978_vm0, %v939_v9, 0.0  ;;  %v133_v61 = vsel %vm982_vm1, %v941_v10, 0.0 }
  0x1a   :  { %v135_v62 = vpack.c.bf16 %v132_v60, %v132_v60  ;;  %v136_v63 = vpack.c.bf16 %v133_v61, %v133_v61  ;;  %v810_v60 = vld [vmem:[%s1134_s3 + $0x4] sm:$0x8]  ;;  %v821_v61 = vld [vmem:[%s1134_s3 + $0x4] sm:$0x10] }
  0x1c   :  { %v217_v0 = vsel %vm86_vm2, %v135_v62, 0 }
  0x1d   :  { %229 = vmatpush.bf16.msra.mxu2 %v217_v0 }
  0x1e   :  { %v263_v12 = vld.sshfl [vmem:[#allocation1 + $0x10] sm:$0xff pattern:$0x75316420] }
  0x1f   :  { %330 = vst [vmem:[#allocation1 + $0x10] ss:$2 sm:$0xff] %v325_v11  ;;  %268 = vrot.lane.b32.xlu2 %v263_v12, %s876_s7  ;;  %v155_v12 = vunpack.c.l.b16 %v139_v7  ;;  %v399_v7 = vld [vmem:[%s1134_s3 + $0x4] sm:$0xc] }
  0x20   :  { %v145_v13 = vld.sshfl [vmem:[#allocation1] sm:$0xff pattern:$0x75316420]  ;;  %v146_v14 = vld.sshfl [vmem:[#allocation1 + $0x8] sm:$0xff pattern:$0x75316420]  ;;  %796 = vmatmul.msk.bf16.vlgmr.msra.gmra.mxu2 %vm177_vm3, %v134_v2 }
  0x21   :  { %v151_v15 = vpack.c.bf16 %v145_v13, %v145_v13  ;;  %258 = vst [vmem:[#allocation1] ss:$2 sm:$0xff] %v923_v1  ;;  %v152_v18 = vpack.c.bf16 %v146_v14, %v146_v14 }
  0x23   :  { %168 = vrot.lane.b32.xlu0 %v151_v15, %s875_s29 }
  0x26   :  { %v333_v17 = vld.sshfl [vmem:[#allocation1 + $0x10] sm:$0xff pattern:$0x75316420] }
  0x27   :  { %404 = vst [vmem:[#allocation1 + $0x10] ss:$2 sm:$0xff] %v398_v16 }
  0x28   :  { %v261_v19 = vld.sshfl [vmem:[#allocation1] sm:$0xff pattern:$0x75316420]  ;;  %v262_v20 = vld.sshfl [vmem:[#allocation1 + $0x8] sm:$0xff pattern:$0x75316420] }
  0x29   :  { %v832_v21 = vpack.i.bf16 %v262_v20, %v261_v19  ;;  %328 = vst [vmem:[#allocation1] ss:$2 sm:$0xff] %v923_v1  ;;  %v156_v19 = vpack.c.b16 %v155_v12, %v155_v12  ;;  %v415_v12 = vunpack.c.l.b16 %v399_v7 }
  0x2b   :  { %833 = vrot.lane.b32.xlu1 %v832_v21, %s876_s7  ;;  %170 = vrot.lane.b32.xlu0 %v152_v18, %s875_s29 }
  0x2e   :  { %v407_v23 = vld.sshfl [vmem:[#allocation1 + $0x10] sm:$0xff pattern:$0x75316420] }
  0x2f   :  { %473 = vst [vmem:[#allocation1 + $0x10] ss:$2 sm:$0xff] %v468_v22  ;;  %v413_v29 = vpack.c.bf16 %v407_v23, %v407_v23  ;;  %v158_v23 = vshrl.u32 %v156_v19, 16 }
  0x30   :  { %v331_v24 = vld.sshfl [vmem:[#allocation1] sm:$0xff pattern:$0x75316420]  ;;  %v332_v25 = vld.sshfl [vmem:[#allocation1 + $0x8] sm:$0xff pattern:$0x75316420] }
  0x31   :  { %402 = vst [vmem:[#allocation1] ss:$2 sm:$0xff] %v923_v1  ;;  %v837_v26 = vpack.i.bf16 %v332_v25, %v331_v24  ;;  %v161_v24 = vshll.u32 %v156_v19, 16  ;;  %v160_v25 = vrot.slane %v158_v23, 1  ;;  %v613_v19 = vld [vmem:[%s1134_s3 + $0x8] sm:$0xc] }
  0x33   :  { %338 = vrot.lane.b32.xlu0 %v333_v17, %s877_s12  ;;  %838 = vrot.lane.b32.xlu2 %v837_v26, %s877_s12  ;;  %v163_v26 = vrot.slane %v161_v24, 2 }
  0x36   :  { %v476_v28 = vld.sshfl [vmem:[#allocation1 + $0x10] sm:$0xff pattern:$0x75316420] }
  0x37   :  { %550 = vst [vmem:[#allocation1 + $0x10] ss:$2 sm:$0xff] %v545_v27 }
  0x38   :  { %v405_v30 = vld.sshfl [vmem:[#allocation1] sm:$0xff pattern:$0x75316420]  ;;  %v406_v31 = vld.sshfl [vmem:[#allocation1 + $0x8] sm:$0xff pattern:$0x75316420] }
  0x39   :  { %v411_v32 = vpack.c.bf16 %v405_v30, %v405_v30  ;;  %471 = vst [vmem:[#allocation1] ss:$2 sm:$0xff] %v923_v1  ;;  %v412_v33 = vpack.c.bf16 %v406_v31, %v406_v31 }
  0x3b   :  { %421 = vrot.lane.b32.xlu1 %v411_v32, %s878_s15  ;;  %425 = vrot.lane.b32.xlu0 %v413_v29, %s878_s15 }
  0x3c   :  { %423 = vrot.lane.b32.xlu2 %v412_v33, %s878_s15 }
  0x3e   :  { %v553_v35 = vld.sshfl [vmem:[#allocation1 + $0x10] sm:$0xff pattern:$0x75316420] }
  0x3f   :  { %618 = vst [vmem:[#allocation1 + $0x10] ss:$2 sm:$0xff] %v612_v34 }
  0x40   :  { %v474_v36 = vld.sshfl [vmem:[#allocation1] sm:$0xff pattern:$0x75316420]  ;;  %v475_v37 = vld.sshfl [vmem:[#allocation1 + $0x8] sm:$0xff pattern:$0x75316420] }
  0x41   :  { %v842_v38 = vpack.i.bf16 %v475_v37, %v474_v36  ;;  %548 = vst [vmem:[#allocation1] ss:$2 sm:$0xff] %v923_v1 }
  0x43   :  { %843 = vrot.lane.b32.xlu1 %v842_v38, %s879_s18  ;;  %v164_v38 = vor.u32 %v163_v26, %v160_v25  ;;  %v416_v25 = vpack.c.b16 %v415_v12, %v415_v12  ;;  %v629_v26 = vunpack.c.l.b16 %v613_v19 }
  0x44   :  { %481 = vrot.lane.b32.xlu2 %v476_v28, %s879_s18 }
  0x46   :  { %v621_v40 = vld.sshfl [vmem:[#allocation1 + $0x10] sm:$0xff pattern:$0x75316420] }
  0x47   :  { %694 = vst [vmem:[#allocation1 + $0x10] ss:$2 sm:$0xff] %v689_v39  ;;  %v627_v44 = vpack.c.bf16 %v621_v40, %v621_v40 }
  0x48   :  { %v551_v41 = vld.sshfl [vmem:[#allocation1] sm:$0xff pattern:$0x75316420]  ;;  %v552_v42 = vld.sshfl [vmem:[#allocation1 + $0x8] sm:$0xff pattern:$0x75316420] }
  0x49   :  { %v847_v43 = vpack.i.bf16 %v552_v42, %v551_v41  ;;  %616 = vst [vmem:[#allocation1] ss:$2 sm:$0xff] %v923_v1 }
  0x4b   :  { %848 = vrot.lane.b32.xlu0 %v847_v43, %s880_s21  ;;  %558 = vrot.lane.b32.xlu1 %v553_v35, %s880_s21 }
  0x4e   :  { %v697_v49 = vld.sshfl [vmem:[#allocation1 + $0x10] sm:$0xff pattern:$0x75316420] }
  0x50   :  { %v620_v45 = vld.sshfl [vmem:[#allocation1 + $0x8] sm:$0xff pattern:$0x75316420]  ;;  %v619_v46 = vld.sshfl [vmem:[#allocation1] sm:$0xff pattern:$0x75316420] }
  0x51   :  { %v626_v47 = vpack.c.bf16 %v620_v45, %v620_v45  ;;  %v625_v48 = vpack.c.bf16 %v619_v46, %v619_v46  ;;  %692 = vst [vmem:[#allocation1] ss:$2 sm:$0xff] %v923_v1  ;;  %v220_v1 = vsel %vm86_vm2, %v136_v63, 0 }
  0x52   :  { %242 = vmatpush.bf16.msra.mxu3 %v220_v1 }
  0x53   :  { %644 = vrot.lane.b32.xlu0 %v626_v47, %s881_s22  ;;  %646 = vrot.lane.b32.xlu1 %v627_v44, %s881_s22 }
  0x54   :  { %642 = vrot.lane.b32.xlu2 %v625_v48, %s881_s22 }
  0x55   :  { %797 = vmatmul.msk.bf16.vlgmr.msra.gmra.mxu3 %vm177_vm3, %v134_v2 }
  0x58   :  { %v695_v50 = vld.sshfl [vmem:[#allocation1] sm:$0xff pattern:$0x75316420]  ;;  %v696_v51 = vld.sshfl [vmem:[#allocation1 + $0x8] sm:$0xff pattern:$0x75316420] }
  0x59   :  { %v852_v52 = vpack.i.bf16 %v696_v51, %v695_v50 }
  0x5b   :  { %702 = vrot.lane.b32.xlu0 %v697_v49, %s882_s2  ;;  %55 = vrot.lane.b32.xlu1 %v931_v4, %s878_s15  ;;  %v347_v4 = vld [vmem:[%s1134_s3 + $0x4] sm:$0x3] }
  0x5c   :  { %853 = vrot.lane.b32.xlu2 %v852_v52, %s882_s2  ;;  %v800_v52 = vld [vmem:[%s1134_s3] sm:$0x8] }
  0x5d   :  { %v801_v55 = vor.u32 %v820_v53, %v800_v52 }
  0x63   :  { %59 = vrot.lane.b32.xlu0 %v929_v3, %s878_s15 }
  0x64   :  { %57 = vrot.lane.b32.xlu2 %v933_v5, %s878_s15  ;;  %v351_v5 = vunpack.c.l.b16 %v347_v4  ;;  %v811_v4 = vor.u32 %v821_v61, %v810_v60 }
  0x66   :  { %v352_v6 = vpack.c.b16 %v351_v5, %v351_v5  ;;  %v500_v5 = vshrl.u32 %v811_v4, 16 }
  0x68   :  { %v356_v8 = vshll.u32 %v352_v6, 16  ;;  %v354_v14 = vshrl.u32 %v352_v6, 16  ;;  %v503_v6 = vshll.u32 %v811_v4, 16 }
  0x6a   :  { %v358_v15 = vrot.slane %v356_v8, 1 }
  0x6c   :  { %v359_v21 = vor.u32 %v358_v15, %v354_v14 }
  0x79   :  { %v269_v3 = vpop.permute.xlu2 %268 }
  0x8b   :  { %v173_v18 = vpop.permute.xlu1 %172 }
  0x8d   :  { %v839_v9 = vpop.permute.xlu2 %838 }
  0x8e   :  { %v841_v10 = vunpack.i.h.bf16 %v839_v9  ;;  %v840_v11 = vunpack.i.l.bf16 %v839_v9 }
  0x90   :  { %v341_v13 = vsel %vm340_vm4, %v840_v11, %v841_v10 }
  0x91   :  { %v345_v16 = vsel %vm978_vm0, %v341_v13, 0.0 }
  0x92   :  { %v348_v17 = vpack.c.bf16 %v345_v16, %v345_v16 }
  0x94   :  { %v364_v20 = vsel %vm86_vm2, %v348_v17, 0  ;;  %v502_v17 = vrot.slane %v500_v5, 3 }
  0x95   :  { %v169_v22 = vpop.permute.xlu0 %168  ;;  %376 = vmatpush.bf16.msrb.mxu2 %v364_v20 }
  0x96   :  { %v424_v27 = vpop.permute.xlu2 %423 }
  0x98   :  { %804 = vmatmul.msk.bf16.vlgmr.msrb.gmra.mxu2 %vm177_vm3, %v359_v21 }
  0x9d   :  { %v834_v28 = vpop.permute.xlu1 %833  ;;  %v171_v29 = vpop.permute.xlu0 %170 }
  0x9e   :  { %v836_v32 = vunpack.i.h.bf16 %v834_v28  ;;  %v835_v33 = vunpack.i.l.bf16 %v834_v28  ;;  %v175_v34 = vsel %vm174_vm5, %v169_v22, %v171_v29  ;;  %v176_v35 = vsel %vm174_vm5, %v171_v29, %v173_v18  ;;  %v482_v49 = vpop.permute.xlu2 %481 }
  0x9f   :  { %v182_v36 = vsel %vm86_vm2, %v175_v34, 0  ;;  %v185_v37 = vsel %vm86_vm2, %v176_v35, 0  ;;  %v505_v18 = vrot.slane %v503_v6, 4 }
  0xa0   :  { %194 = vmatpush.bf16.msra.mxu0 %v182_v36  ;;  %207 = vmatpush.bf16.msra.mxu1 %v185_v37  ;;  %v271_v39 = vsel %vm270_vm7, %v835_v33, %v836_v32  ;;  %v272_v40 = vsel %vm270_vm7, %v836_v32, %v269_v3  ;;  %v286_v3 = vrot.slane %v801_v55, 3  ;;  %v417_v37 = vrot.slane %v416_v25, 2 }
  0xa1   :  { %v275_v41 = vsel %vm1010_vm6, %v271_v39, 0.0  ;;  %v276_v42 = vsel %vm1014_vm8, %v272_v40, 0.0  ;;  %v506_v29 = vor.u32 %v505_v18, %v502_v17 }
  0xa2   :  { %v279_v43 = vpack.c.bf16 %v275_v41, %v275_v41  ;;  %v280_v44 = vpack.c.bf16 %v276_v42, %v276_v42 }
  0xa3   :  { %794 = vmatmul.msk.bf16.vlgmr.msra.gmra.mxu0 %vm177_vm3, %v164_v38  ;;  %795 = vmatmul.msk.bf16.vlgmr.msra.gmra.mxu1 %vm177_vm3, %v164_v38  ;;  %v630_v38 = vpack.c.b16 %v629_v26, %v629_v26  ;;  %v231_v31 = vpop.f32.mrf.mxu2 }
  0xa4   :  { %v291_v45 = vsel %vm86_vm2, %v279_v43, 0  ;;  %v294_v46 = vsel %vm86_vm2, %v280_v44, 0 }
  0xa5   :  { %303 = vmatpush.bf16.msrb.mxu0 %v291_v45  ;;  %316 = vmatpush.bf16.msrb.mxu1 %v294_v46  ;;  %v339_v47 = vpop.permute.xlu0 %338  ;;  %v632_v45 = vshrl.u32 %v630_v38, 16  ;;  %v635_v58 = vshll.u32 %v630_v38, 16 }
  0xa6   :  { %v342_v48 = vsel %vm340_vm4, %v841_v10, %v339_v47  ;;  %v37_v47 = vld [vmem:[%s1132_s1] sm:$0xff] }
  0xa7   :  { %v346_v50 = vsel %vm982_vm1, %v342_v48, 0.0 }
  0xa8   :  { %v349_v51 = vpack.c.bf16 %v346_v50, %v346_v50  ;;  %v883_v50 = vmov 0  }
  0xa9   :  { %857 = vset.pattern.permute.xlu1 %v883_v50  ;;  %859 = vset.pattern.permute.xlu0 %v883_v50 }
  0xaa   :  { %v367_v54 = vsel %vm86_vm2, %v349_v51, 0  ;;  %v39_v51 = vld [vmem:[%s1132_s1 + $0x10] sm:$0xff]  ;;  %44 = vperm.xlu1 %857, %v37_v47   ;;  %858 = vset.pattern.permute.xlu2 %v883_v50 }
  0xab   :  { %389 = vmatpush.bf16.msrb.mxu3 %v367_v54  ;;  %753 = vperm.xlu0 %859, %v39_v51  }
  0xad   :  { %v422_v56 = vpop.permute.xlu1 %421  ;;  %v426_v57 = vpop.permute.xlu0 %425 }
  0xae   :  { %v428_v62 = vsel %vm61_vm9, %v422_v56, %v424_v27  ;;  %805 = vmatmul.msk.bf16.vlgmr.msrb.gmra.mxu3 %vm177_vm3, %v359_v21  ;;  %v429_v63 = vsel %vm61_vm9, %v424_v27, %v426_v57  ;;  %v1047_v0 = vpop.permute.xlu2 %642  ;;  %v38_v56 = vld [vmem:[%s1132_s1 + $0x8] sm:$0xff] }
  0xaf   :  { %v434_v1 = vsel %vm86_vm2, %v428_v62, 0  ;;  %v437_v2 = vsel %vm86_vm2, %v429_v63, 0  ;;  %v634_v62 = vrot.slane %v632_v45, 2  ;;  %v637_v63 = vrot.slane %v635_v58, 3  ;;  %70 = vperm.xlu2 %858, %v38_v56  }
  0xb0   :  { %446 = vmatpush.bf16.msra.mxu0 %v434_v1  ;;  %459 = vmatpush.bf16.msra.mxu1 %v437_v2 }
  0xb1   :  { %v638_v1 = vor.u32 %v637_v63, %v634_v62 }
  0xb3   :  { %802 = vmatmul.msk.bf16.vlgmr.msrb.gmra.mxu0 %vm177_vm3, %v286_v3  ;;  %803 = vmatmul.msk.bf16.vlgmr.msrb.gmra.mxu1 %vm177_vm3, %v286_v3 }
  0xb5   :  { %v844_v8 = vpop.permute.xlu1 %843 }
  0xb6   :  { %v846_v9 = vunpack.i.h.bf16 %v844_v8  ;;  %v845_v10 = vunpack.i.l.bf16 %v844_v8  ;;  %v1056_v11 = vpop.permute.xlu2 %853  ;;  %v711_v8 = vld [vmem:[%s1134_s3 + $0xc] sm:$0x3] }
  0xb7   :  { %v856_v13 = vunpack.i.h.bf16 %v1056_v11  ;;  %v855_v14 = vunpack.i.l.bf16 %v1056_v11 }
  0xb8   :  { %v484_v15 = vsel %vm483_vm10, %v845_v10, %v846_v9  ;;  %v485_v16 = vsel %vm483_vm10, %v846_v9, %v482_v49  ;;  %v567_v49 = vld [vmem:[%s1134_s3 + $0x8] sm:$0x6]  ;;  %v233_v10 = vpop.f32.mrf.mxu2  ;;  %s790_s3 = sld [smem:[#allocation2 + $0x2]] }
  0xb9   :  { %v489_v20 = vsel %vm1014_vm8, %v485_v16, 0.0  ;;  %v488_v21 = vsel %vm1010_vm6, %v484_v15, 0.0  ;;  %v705_v22 = vsel %vm704_vm11, %v855_v14, %v856_v13  ;;  %v571_v61 = vunpack.c.l.b16 %v567_v49 }
  0xba   :  { %v493_v23 = vpack.c.bf16 %v489_v20, %v489_v20  ;;  %v492_v24 = vpack.c.bf16 %v488_v21, %v488_v21  ;;  %v709_v32 = vsel %vm1010_vm6, %v705_v22, 0.0 }
  0xbb   :  { %v712_v39 = vpack.c.bf16 %v709_v32, %v709_v32 }
  0xbc   :  { %v514_v27 = vsel %vm86_vm2, %v493_v23, 0  ;;  %v511_v28 = vsel %vm86_vm2, %v492_v24, 0 }
  0xbd   :  { %536 = vmatpush.bf16.msra.mxu3 %v514_v27  ;;  %v849_v33 = vpop.permute.xlu0 %848  ;;  %523 = vmatpush.bf16.msra.mxu2 %v511_v28  ;;  %v559_v34 = vpop.permute.xlu1 %558  ;;  %v718_v46 = vsel %vm86_vm2, %v712_v39, 0 }
  0xbe   :  { %v851_v35 = vunpack.i.h.bf16 %v849_v33  ;;  %v850_v36 = vunpack.i.l.bf16 %v849_v33  ;;  %v58_v22 = vpop.permute.xlu2 %57 }
  0xc0   :  { %v561_v40 = vsel %vm560_vm12, %v850_v36, %v851_v35  ;;  %v562_v41 = vsel %vm560_vm12, %v851_v35, %v559_v34  ;;  %812 = vmatmul.msk.bf16.vlgmr.msra.gmra.mxu2 %vm177_vm3, %v506_v29  ;;  %813 = vmatmul.msk.bf16.vlgmr.msra.gmra.mxu3 %vm177_vm3, %v506_v29 }
  0xc1   :  { %v566_v30 = vsel %vm982_vm1, %v562_v41, 0.0  ;;  %v565_v42 = vsel %vm978_vm0, %v561_v40, 0.0  ;;  %v80_v40 = vstv %s791_s23  ;;  %vm775_vm0 = vsmask.f32 3328  ;;  %vm773_vm1 = vmand %vm86_vm2, %vm772_vm14 }
  0xc2   :  { %v569_v43 = vpack.c.bf16 %v566_v30, %v566_v30  ;;  %v568_v44 = vpack.c.bf16 %v565_v42, %v565_v42 }
  0xc3   :  { %806 = vmatmul.msk.bf16.vlgmr.msra.gmra.mxu0 %vm177_vm3, %v417_v37  ;;  %807 = vmatmul.msk.bf16.vlgmr.msra.gmra.mxu1 %vm177_vm3, %v417_v37  ;;  %v77_v37 = vstv %s790_s3 }
  0xc4   :  { %v578_v59 = vsel %vm86_vm2, %v568_v44, 0  ;;  %v581_v48 = vsel %vm86_vm2, %v569_v43, 0 }
  0xc5   :  { %v645_v52 = vpop.permute.xlu0 %644  ;;  %590 = vmatpush.bf16.msrb.mxu0 %v578_v59  ;;  %603 = vmatpush.bf16.msrb.mxu1 %v581_v48  ;;  %v647_v53 = vpop.permute.xlu1 %646 }
  0xc6   :  { %v649_v54 = vsel %vm648_vm13, %v1047_v0, %v645_v52  ;;  %v650_v55 = vsel %vm648_vm13, %v645_v52, %v647_v53  ;;  %v572_v0 = vpack.c.b16 %v571_v61, %v571_v61 }
  0xc7   :  { %v655_v57 = vsel %vm86_vm2, %v649_v54, 0  ;;  %v658_v60 = vsel %vm86_vm2, %v650_v55, 0 }
  0xc8   :  { %667 = vmatpush.bf16.msrb.mxu2 %v655_v57  ;;  %680 = vmatpush.bf16.msrb.mxu3 %v658_v60  ;;  %v573_v5 = vrot.slane %v572_v0, 1 }
  0xc9   :  { %730 = vmatpush.bf16.msra.mxu0 %v718_v46 }
  0xcd   :  { %v703_v2 = vpop.permute.xlu0 %702  ;;  %v56_v18 = vpop.permute.xlu1 %55 }
  0xce   :  { %v706_v3 = vsel %vm704_vm11, %v856_v13, %v703_v2  ;;  %v62_v24 = vsel %vm61_vm9, %v56_v18, %v58_v22 }
  0xcf   :  { %v710_v4 = vsel %vm1014_vm8, %v706_v3, 0.0 }
  0xd0   :  { %v713_v6 = vpack.c.bf16 %v710_v4, %v710_v4  ;;  %816 = vmatmul.msk.bf16.vlgmr.msrb.gmra.mxu2 %vm177_vm3, %v638_v1  ;;  %817 = vmatmul.msk.bf16.vlgmr.msrb.gmra.mxu3 %vm177_vm3, %v638_v1 }
  0xd2   :  { %v721_v7 = vsel %vm86_vm2, %v713_v6, 0 }
  0xd3   :  { %814 = vmatmul.msk.bf16.vlgmr.msrb.gmra.mxu0 %vm177_vm3, %v573_v5  ;;  %815 = vmatmul.msk.bf16.vlgmr.msrb.gmra.mxu1 %vm177_vm3, %v573_v5 }
  0xd4   :  { %743 = vmatpush.bf16.msra.mxu1 %v721_v7 }
  0xd5   :  { %v60_v23 = vpop.permute.xlu0 %59 }
  0xd6   :  { %v63_v25 = vsel %vm61_vm9, %v58_v22, %v60_v23 }
  0xd8   :  { %v244_v9 = vpop.f32.mrf.mxu3 }
  0xe0   :  { %v246_v11 = vpop.f32.mrf.mxu3 }
  0xe3   :  { %818 = vmatmul.msk.bf16.vlgmr.msra.gmra.mxu0 %vm177_vm3, %v711_v8  ;;  %819 = vmatmul.msk.bf16.vlgmr.msra.gmra.mxu1 %vm177_vm3, %v711_v8  ;;  %vm776_vm3 = vmand %vm774_vm15, %vm775_vm0 }
  0xe4   :  { %vm777_vm4 = vmor %vm776_vm3, %vm773_vm1 }
 0x109   :  { %v71_v34 = vpop.permute.xlu2 %70 }
 0x11b   :  { %v378_v12 = vpop.f32.mrf.mxu2 }
 0x11c   :  { %v45_v29 = vpop.permute.xlu1 %44 }
 0x11d   :  { %v66_v32 = vmul.f32 %v62_v24, %v45_v29  ;;  %v67_v33 = vmul.f32 %v63_v25, %v45_v29 }
 0x11f   :  { %v73_v35 = vadd.f32 %v71_v34, %v66_v32  ;;  %v74_v36 = vadd.f32 %v71_v34, %v67_v33 }
 0x120   :  { %v196_v13 = vpop.f32.mrf.mxu0  ;;  %v209_v14 = vpop.f32.mrf.mxu1 }
 0x121   :  { %v75_v38 = vmax.f32 %v73_v35, 0.0  ;;  %v76_v39 = vmax.f32 %v74_v36, 0.0  ;;  %v232_v53 = vadd.f32 %v231_v31, %v196_v13  ;;  %v245_v54 = vadd.f32 %v244_v9, %v209_v14  ;;  %v754_v13 = vpop.permute.xlu0 %753 }
 0x123   :  { %v380_v15 = vpop.f32.mrf.mxu2  ;;  %v78_v42 = vmul.f32 %v77_v37, %v75_v38  ;;  %v79_v43 = vmul.f32 %v77_v37, %v76_v39 }
 0x125   :  { %v81_v44 = vadd.f32 %v80_v40, %v78_v42  ;;  %v82_v45 = vadd.f32 %v80_v40, %v79_v43 }
 0x127   :  { %v83_v59 = vpack.c.bf16 %v82_v45, %v81_v44 }
 0x128   :  { %v198_v16 = vpop.f32.mrf.mxu0  ;;  %v211_v17 = vpop.f32.mrf.mxu1 }
 0x129   :  { %v85_v48 = vrot.slane %v83_v59, 2  ;;  %v758_v17 = vstv %s792_s26 }
 0x12b   :  { %v89_v50 = vsel %vm86_vm2, %v83_v59, %v85_v48 }
 0x12c   :  { %91 = vst [vmem:[%s1135_s4] sm:$0xf] %v89_v50  ;;  %s793_s4 = sld [smem:[#allocation2 + $0x5]] }
 0x130   :  { %v305_v19 = vpop.f32.mrf.mxu0  ;;  %v318_v20 = vpop.f32.mrf.mxu1 }
 0x131   :  { %v391_v21 = vpop.f32.mrf.mxu3  ;;  %v322_v55 = vadd.f32 %v305_v19, %v232_v53  ;;  %v323_v56 = vadd.f32 %v318_v20, %v245_v54 }
 0x132   :  { %v761_v20 = vstv %s793_s4 }
 0x133   :  { %v395_v61 = vadd.f32 %v378_v12, %v322_v55  ;;  %v396_v62 = vadd.f32 %v391_v21, %v323_v56 }
 0x138   :  { %v307_v26 = vpop.f32.mrf.mxu0  ;;  %v320_v27 = vpop.f32.mrf.mxu1 }
 0x139   :  { %v393_v28 = vpop.f32.mrf.mxu3 }
 0x13a   :  { %v778_v28 = vld [vmem:[%s1136_s5] sm:$0xf] }
 0x140   :  { %v448_v41 = vpop.f32.mrf.mxu0  ;;  %v461_v30 = vpop.f32.mrf.mxu1 }
 0x141   :  { %v465_v1 = vadd.f32 %v448_v41, %v395_v61  ;;  %v466_v2 = vadd.f32 %v461_v30, %v396_v62 }
 0x143   :  { %v525_v46 = vpop.f32.mrf.mxu2  ;;  %v538_v47 = vpop.f32.mrf.mxu3 }
 0x144   :  { %v542_v5 = vadd.f32 %v525_v46, %v465_v1  ;;  %v543_v6 = vadd.f32 %v538_v47, %v466_v2 }
 0x148   :  { %v450_v58 = vpop.f32.mrf.mxu0  ;;  %v463_v49 = vpop.f32.mrf.mxu1 }
 0x14b   :  { %v527_v51 = vpop.f32.mrf.mxu2  ;;  %v540_v52 = vpop.f32.mrf.mxu3 }
 0x150   :  { %v592_v57 = vpop.f32.mrf.mxu0  ;;  %v605_v60 = vpop.f32.mrf.mxu1 }
 0x151   :  { %v609_v7 = vadd.f32 %v592_v57, %v542_v5  ;;  %v610_v8 = vadd.f32 %v605_v60, %v543_v6 }
 0x153   :  { %v669_v63 = vpop.f32.mrf.mxu2  ;;  %v682_v0 = vpop.f32.mrf.mxu3 }
 0x154   :  { %v686_v9 = vadd.f32 %v669_v63, %v609_v7  ;;  %v687_v11 = vadd.f32 %v682_v0, %v610_v8 }
 0x158   :  { %v594_v3 = vpop.f32.mrf.mxu0  ;;  %v607_v4 = vpop.f32.mrf.mxu1 }
 0x15b   :  { %v671_v10 = vpop.f32.mrf.mxu2  ;;  %v684_v31 = vpop.f32.mrf.mxu3 }
 0x160   :  { %v732_v14 = vpop.f32.mrf.mxu0  ;;  %v745_v12 = vpop.f32.mrf.mxu1 }
 0x161   :  { %v749_v15 = vadd.f32 %v732_v14, %v686_v9  ;;  %v750_v16 = vadd.f32 %v745_v12, %v687_v11 }
 0x163   :  { %v756_v18 = vadd.f32 %v754_v13, %v749_v15  ;;  %v757_v19 = vadd.f32 %v754_v13, %v750_v16 }
 0x165   :  { %v759_v21 = vmul.f32 %v758_v17, %v756_v18  ;;  %v760_v22 = vmul.f32 %v758_v17, %v757_v19 }
 0x167   :  { %v762_v23 = vadd.f32 %v761_v20, %v759_v21  ;;  %v763_v24 = vadd.f32 %v761_v20, %v760_v22 }
 0x168   :  { %v734_v25 = vpop.f32.mrf.mxu0  ;;  %v747_v26 = vpop.f32.mrf.mxu1 }
 0x169   :  { %v764_v27 = vpack.c.bf16 %v763_v24, %v762_v23 }
 0x16b   :  { %v766_v29 = vrot.slane %v764_v27, 2 }
 0x16d   :  { %v769_v32 = vsel %vm86_vm2, %v764_v27, %v766_v29 }
 0x16e   :  { %v779_v33 = vsel %vm777_vm4, %v769_v32, %v778_v28 }
 0x16f   :  { %780 = vst [vmem:[%s1136_s5] sm:$0xf] %v779_v33 }
 0x170   :  { %789 = vsyncpa [#allocation3], 1 }

</bundles_post_ra>
